<compile_context>
chip_gen: v7x
topology: tpu7x:2x2x1
jax: 0.10.0
libtpu: 0.0.40
codegen_flags: <defaults>
</compile_context>

<pallas_src>
import jax
import jax.numpy as jnp
from jax.experimental import pallas as pl
from jax.experimental.pallas import tpu as pltpu

HIDDEN = 50        # logical hidden width (PyTorch module)
HP = 128           # padded hidden width: one full lane-row per activation vreg
N_MID = 4          # layers 2..5 are the dense (50,50) -> (HP,HP) MXU matmuls


def mlp_kernel(x_ref, misc_ref, w_mid_ref, o_ref):
    x_row = x_ref[0]                      # (1, tb)   lane-dense input slab
    misc = misc_ref[...]                  # (HP, 8)   packed small operands
    w_in_col = misc[:, 5:6]               # (HP, 1)   layer-1 weight column
    w_out_col = misc[:, 6:7]              # (HP, 1)   layer-6 weight column
    b_out = misc[0:1, 7:8]                # (1, 1)    layer-6 bias

    # Layer 1 (1 -> HP): K=1 contraction as a VPU broadcast outer product.
    h = jnp.tanh(w_in_col * x_row + misc[:, 0:1])                  # (HP, tb)

    # Layers 2..5 (HP -> HP): lane-aligned MXU matmuls in transposed space,
    # f32 accumulate.  W_pt (out,in) @ h^T (HP, tb) -> (HP, tb).
    for l in range(N_MID):
        h = jnp.tanh(
            jnp.dot(w_mid_ref[l], h, preferred_element_type=jnp.float32)
            + misc[:, l + 1:l + 2])

    # Layer 6 (HP -> 1): VPU multiply + sublane (XLU) reduction; result is a
    # lane-dense (1, tb) row -> unmasked stores.
    out_row = jnp.sum(h * w_out_col, axis=0, keepdims=True) + b_out
    o_ref[0] = out_row.astype(o_ref.dtype)


def _cdiv(a, b):
    return (a + b - 1) // b


def _round_up(x, m):
    return ((x + m - 1) // m) * m


def _min_grid_tiles():
    """2 on v7x (2 TensorCores/chip) so the 'parallel' batch axis shards; else 1."""
    try:
        kind = jax.devices()[0].device_kind.lower()
        if "7" in kind:
            return 2
    except Exception:
        pass
    return 1


def pack_params(params):
    """Pack the 6 (W, b) pairs into 2 lane-aligned operands for the kernel.

    params: list of (W, b) with W of shape (in, out) and b of shape (1, out)
    (i.e. y = x @ W + b, mirroring PyTorch nn.Linear which stores W^T).

    Returns:
      misc : (HP, 8) f32 — cols 0..4 = hidden biases (as columns),
             col 5 = layer-1 weight column, col 6 = layer-6 weight column,
             row 0 of col 7 = output bias.
      w_mid: (4, HP, HP) f32 — mid-layer weights in PyTorch (out, in) layout,
             zero-padded to HP.
    """
    def pad_to(a, shape):
        a = jnp.asarray(a, jnp.float32)
        return jnp.pad(a, [(0, s - d) for d, s in zip(a.shape, shape)])

    (w1, b1), *mid, (w6, b6) = params
    cols = []
    for b in [b1] + [b for (_, b) in mid]:
        cols.append(pad_to(jnp.asarray(b, jnp.float32).reshape(-1, 1), (HP, 1)))
    cols.append(pad_to(w1.T, (HP, 1)))                                # w_in column
    cols.append(pad_to(w6, (HP, 1)))                                  # w_out column
    cols.append(pad_to(jnp.asarray(b6, jnp.float32).reshape(1, 1), (HP, 1)))
    misc = jnp.concatenate(cols, axis=1)                              # (HP, 8)

    w_mid = jnp.stack([pad_to(w.T, (HP, HP)) for (w, _) in mid])      # (4, HP, HP)
    return misc, w_mid


def neural_network_prueba_forward(x, params, *, tb=None):
    """x: (B, 1) float32. params: list of (W, b) in (in,out)/(1,out) layout."""
    misc, w_mid = pack_params(params)

    B = x.shape[0]
    min_tiles = _min_grid_tiles()
    if tb is None:
        # Big tiles (<=1024 rows) to amortize per-step overhead; single step on
        # single-TC chips for small B; even number of steps on v7x.
        num_tiles = _round_up(max(min_tiles, _cdiv(B, 1024)), min_tiles)
        tb = _round_up(_cdiv(B, num_tiles), 128)
    else:
        tb = _round_up(tb, 128)
        num_tiles = _round_up(max(min_tiles, _cdiv(B, tb)), min_tiles)
    b_pad = tb * num_tiles

    # Lane-dense input slab: (num_tiles, 1, tb); tile i holds rows [i*tb,(i+1)*tb).
    x_p = jnp.pad(x.astype(jnp.float32).reshape(-1), (0, b_pad - B))
    x_p = x_p.reshape(num_tiles, 1, tb)

    weight_bytes = int(misc.size + w_mid.size) * 4
    cost = pl.CostEstimate(
        flops=2 * b_pad * (N_MID * HP * HP + 2 * HP),
        transcendentals=5 * b_pad * HP,
        bytes_accessed=(x_p.size + b_pad) * 4 + weight_bytes,
    )

    out = pl.pallas_call(
        mlp_kernel,
        out_shape=jax.ShapeDtypeStruct((num_tiles, 1, tb), jnp.float32),
        grid=(num_tiles,),
        in_specs=[
            pl.BlockSpec((1, 1, tb), lambda i: (i, 0, 0)),            # x: tiled batch
            pl.BlockSpec((HP, 8), lambda i: (0, 0)),                  # packed small slab
            pl.BlockSpec((N_MID, HP, HP), lambda i: (0, 0, 0)),       # mid weights
        ],
        out_specs=pl.BlockSpec((1, 1, tb), lambda i: (i, 0, 0)),      # lane-dense out
        compiler_params=pltpu.CompilerParams(
            dimension_semantics=("parallel",)),                       # megacore on v7x
        cost_estimate=cost,
    )(x_p, misc, w_mid)

    return out.reshape(b_pad, 1)[:B]


def init_params(key):
    """Deterministic init mimicking nn.Linear shapes (stored as (in,out))."""
    dims = [(1, HIDDEN), (HIDDEN, HIDDEN), (HIDDEN, HIDDEN),
            (HIDDEN, HIDDEN), (HIDDEN, HIDDEN), (HIDDEN, 1)]
    params = []
    for (fan_in, fan_out) in dims:
        key, kw, kb = jax.random.split(key, 3)
        bound = 1.0 / jnp.sqrt(fan_in)
        w = jax.random.uniform(kw, (fan_in, fan_out), jnp.float32,
                               minval=-bound, maxval=bound)
        b = jax.random.uniform(kb, (1, fan_out), jnp.float32,
                               minval=-bound, maxval=bound)
        params.append((w, b))
    return params


def reference_forward(x, params):
    h = x
    for i, (w, b) in enumerate(params):
        h = h @ w + b
        if i < len(params) - 1:
            h = jnp.tanh(h)
    return h


if __name__ == "__main__":
    key = jax.random.PRNGKey(0)
    key, kx = jax.random.split(key)
    B = 256
    x = jax.random.normal(kx, (B, 1), jnp.float32)  # angles fed to the sin-fit MLP

    params = init_params(key)

    out = neural_network_prueba_forward(x, params)
    out = jax.block_until_ready(out)

    ref = reference_forward(x, params)
    assert out.shape == (B, 1)
    assert jnp.allclose(out, ref, atol=1e-5, rtol=1e-5), \
        float(jnp.max(jnp.abs(out - ref)))

    print("KERNEL_OK")
</pallas_src>

<mosaic_0001>
module attributes {stable_mosaic.version = 11 : i64} {
  func.func @mlp_kernel(%arg0: i32, %arg1: memref<1x1x256xf32, #tpu.memory_space<vmem>>, %arg2: memref<128x8xf32, #tpu.memory_space<vmem>>, %arg3: memref<4x128x128xf32, #tpu.memory_space<vmem>>, %arg4: memref<1x1x256xf32, #tpu.memory_space<vmem>>) attributes {dimension_semantics = [#tpu.dimension_semantics<parallel>], iteration_bounds = array<i64: 1>, scalar_prefetch = 0 : i64, scratch_operands = 0 : i64, tpu.core_type = #tpu.core_type<tc>, window_params = [{transform_indices = @transform_0, window_bounds = array<i64: 1, 1, 256>}, {pipeline_mode = #tpu.pipeline_mode<synchronous>, transform_indices = @transform_1, window_bounds = array<i64: 128, 8>}, {pipeline_mode = #tpu.pipeline_mode<synchronous>, transform_indices = @transform_2, window_bounds = array<i64: 4, 128, 128>}, {transform_indices = @transform_3, window_bounds = array<i64: 1, 1, 256>}]} {
    %c0 = arith.constant 0 : index
    %c0_0 = arith.constant 0 : index
    %c0_1 = arith.constant 0 : index
    %0 = vector.load %arg1[%c0, %c0_0, %c0_1] : memref<1x1x256xf32, #tpu.memory_space<vmem>>, vector<1x1x256xf32>
    %1 = vector.shape_cast %0 : vector<1x1x256xf32> to vector<1x256xf32>
    %c0_2 = arith.constant 0 : index
    %c0_3 = arith.constant 0 : index
    %2 = vector.load %arg2[%c0_2, %c0_3] : memref<128x8xf32, #tpu.memory_space<vmem>>, vector<128x8xf32>
    %3 = vector.extract_strided_slice %2 {offsets = [0, 5], sizes = [128, 1], strides = [1, 1]} : vector<128x8xf32> to vector<128x1xf32>
    %4 = vector.extract_strided_slice %2 {offsets = [0, 6], sizes = [128, 1], strides = [1, 1]} : vector<128x8xf32> to vector<128x1xf32>
    %5 = vector.extract_strided_slice %2 {offsets = [0, 7], sizes = [1, 1], strides = [1, 1]} : vector<128x8xf32> to vector<1x1xf32>
    %6 = vector.broadcast %3 : vector<128x1xf32> to vector<128x256xf32>
    %7 = vector.broadcast %1 : vector<1x256xf32> to vector<128x256xf32>
    %8 = arith.mulf %6, %7 : vector<128x256xf32>
    %9 = vector.extract_strided_slice %2 {offsets = [0, 0], sizes = [128, 1], strides = [1, 1]} : vector<128x8xf32> to vector<128x1xf32>
    %10 = vector.broadcast %9 : vector<128x1xf32> to vector<128x256xf32>
    %11 = arith.addf %8, %10 : vector<128x256xf32>
    %12 = math.tanh %11 : vector<128x256xf32>
    %c0_4 = arith.constant 0 : index
    %c0_5 = arith.constant 0 : index
    %c0_6 = arith.constant 0 : index
    %13 = vector.load %arg3[%c0_4, %c0_5, %c0_6] : memref<4x128x128xf32, #tpu.memory_space<vmem>>, vector<1x128x128xf32>
    %14 = vector.shape_cast %13 : vector<1x128x128xf32> to vector<128x128xf32>
    %cst = arith.constant dense<0.000000e+00> : vector<128x256xf32>
    %15 = tpu.matmul %14, %12, %cst {dimension_numbers = #tpu.dot_dimension_numbers<[1], [0], [0], [1], [0, 0, 1, 1], [], []>} : vector<128x128xf32>, vector<128x256xf32>, vector<128x256xf32> -> vector<128x256xf32>
    %16 = vector.extract_strided_slice %2 {offsets = [0, 1], sizes = [128, 1], strides = [1, 1]} : vector<128x8xf32> to vector<128x1xf32>
    %17 = vector.broadcast %16 : vector<128x1xf32> to vector<128x256xf32>
    %18 = arith.addf %15, %17 : vector<128x256xf32>
    %19 = math.tanh %18 : vector<128x256xf32>
    %c1 = arith.constant 1 : index
    %c0_7 = arith.constant 0 : index
    %c0_8 = arith.constant 0 : index
    %20 = vector.load %arg3[%c1, %c0_7, %c0_8] : memref<4x128x128xf32, #tpu.memory_space<vmem>>, vector<1x128x128xf32>
    %21 = vector.shape_cast %20 : vector<1x128x128xf32> to vector<128x128xf32>
    %cst_9 = arith.constant dense<0.000000e+00> : vector<128x256xf32>
    %22 = tpu.matmul %21, %19, %cst_9 {dimension_numbers = #tpu.dot_dimension_numbers<[1], [0], [0], [1], [0, 0, 1, 1], [], []>} : vector<128x128xf32>, vector<128x256xf32>, vector<128x256xf32> -> vector<128x256xf32>
    %23 = vector.extract_strided_slice %2 {offsets = [0, 2], sizes = [128, 1], strides = [1, 1]} : vector<128x8xf32> to vector<128x1xf32>
    %24 = vector.broadcast %23 : vector<128x1xf32> to vector<128x256xf32>
    %25 = arith.addf %22, %24 : vector<128x256xf32>
    %26 = math.tanh %25 : vector<128x256xf32>
    %c2 = arith.constant 2 : index
    %c0_10 = arith.constant 0 : index
    %c0_11 = arith.constant 0 : index
    %27 = vector.load %arg3[%c2, %c0_10, %c0_11] : memref<4x128x128xf32, #tpu.memory_space<vmem>>, vector<1x128x128xf32>
    %28 = vector.shape_cast %27 : vector<1x128x128xf32> to vector<128x128xf32>
    %cst_12 = arith.constant dense<0.000000e+00> : vector<128x256xf32>
    %29 = tpu.matmul %28, %26, %cst_12 {dimension_numbers = #tpu.dot_dimension_numbers<[1], [0], [0], [1], [0, 0, 1, 1], [], []>} : vector<128x128xf32>, vector<128x256xf32>, vector<128x256xf32> -> vector<128x256xf32>
    %30 = vector.extract_strided_slice %2 {offsets = [0, 3], sizes = [128, 1], strides = [1, 1]} : vector<128x8xf32> to vector<128x1xf32>
    %31 = vector.broadcast %30 : vector<128x1xf32> to vector<128x256xf32>
    %32 = arith.addf %29, %31 : vector<128x256xf32>
    %33 = math.tanh %32 : vector<128x256xf32>
    %c3 = arith.constant 3 : index
    %c0_13 = arith.constant 0 : index
    %c0_14 = arith.constant 0 : index
    %34 = vector.load %arg3[%c3, %c0_13, %c0_14] : memref<4x128x128xf32, #tpu.memory_space<vmem>>, vector<1x128x128xf32>
    %35 = vector.shape_cast %34 : vector<1x128x128xf32> to vector<128x128xf32>
    %cst_15 = arith.constant dense<0.000000e+00> : vector<128x256xf32>
    %36 = tpu.matmul %35, %33, %cst_15 {dimension_numbers = #tpu.dot_dimension_numbers<[1], [0], [0], [1], [0, 0, 1, 1], [], []>} : vector<128x128xf32>, vector<128x256xf32>, vector<128x256xf32> -> vector<128x256xf32>
    %37 = vector.extract_strided_slice %2 {offsets = [0, 4], sizes = [128, 1], strides = [1, 1]} : vector<128x8xf32> to vector<128x1xf32>
    %38 = vector.broadcast %37 : vector<128x1xf32> to vector<128x256xf32>
    %39 = arith.addf %36, %38 : vector<128x256xf32>
    %40 = math.tanh %39 : vector<128x256xf32>
    %41 = vector.broadcast %4 : vector<128x1xf32> to vector<128x256xf32>
    %42 = arith.mulf %40, %41 : vector<128x256xf32>
    %cst_16 = arith.constant dense<0.000000e+00> : vector<256xf32>
    %43 = vector.multi_reduction <add>, %42, %cst_16 [0] : vector<128x256xf32> to vector<256xf32>
    %44 = vector.shape_cast %43 : vector<256xf32> to vector<1x256xf32>
    %45 = vector.broadcast %5 : vector<1x1xf32> to vector<1x256xf32>
    %46 = arith.addf %44, %45 : vector<1x256xf32>
    %c0_17 = arith.constant 0 : index
    %c0_18 = arith.constant 0 : index
    %c0_19 = arith.constant 0 : index
    %47 = vector.load %arg4[%c0_17, %c0_18, %c0_19] : memref<1x1x256xf32, #tpu.memory_space<vmem>>, vector<1x1x256xf32>
    %48 = vector.shape_cast %47 : vector<1x1x256xf32> to vector<1x256xf32>
    %49 = vector.shape_cast %46 : vector<1x256xf32> to vector<1x1x256xf32>
    tpu.vector_store %arg4[%c0_17, %c0_18, %c0_19], %49 {strides = array<i32>} : memref<1x1x256xf32, #tpu.memory_space<vmem>>, vector<1x1x256xf32>,
    return
  }
  func.func @transform_0(%arg0: i32) -> (i32, i32, i32) {
    %c0_i32 = arith.constant 0 : i32
    %c0_i32_0 = arith.constant 0 : i32
    %c0_i32_1 = arith.constant 0 : i32
    return %arg0, %c0_i32, %c0_i32_0 : i32, i32, i32
  }
  func.func @transform_1(%arg0: i32) -> (i32, i32) {
    %c0_i32 = arith.constant 0 : i32
    %c0_i32_0 = arith.constant 0 : i32
    %c0_i32_1 = arith.constant 0 : i32
    return %c0_i32, %c0_i32_0 : i32, i32
  }
  func.func @transform_2(%arg0: i32) -> (i32, i32, i32) {
    %c0_i32 = arith.constant 0 : i32
    %c0_i32_0 = arith.constant 0 : i32
    %c0_i32_1 = arith.constant 0 : i32
    %c0_i32_2 = arith.constant 0 : i32
    return %c0_i32, %c0_i32_0, %c0_i32_1 : i32, i32, i32
  }
  func.func @transform_3(%arg0: i32) -> (i32, i32, i32) {
    %c0_i32 = arith.constant 0 : i32
    %c0_i32_0 = arith.constant 0 : i32
    %c0_i32_1 = arith.constant 0 : i32
    return %arg0, %c0_i32, %c0_i32_0 : i32, i32, i32
  }
}

</mosaic_0001>

<bundles_post_ra>
// kernel: tpu_custom_call.1
= control target key start
LH: loop header
LB: loop body
LE: loop exit
PB: predicated region body
PF: predicated region fallthrough
CT: control target
= control target key end

     0   :  { %8 = vsyncpa [#allocation3], 0  ;;  %s2644_s0 = inlined_call_operand.vmem [shape: f32[1,1,256], index: 0, kind: input, shape index: {}]   ;;  %s2645_s1 = inlined_call_operand.vmem [shape: f32[128,8], index: 1, kind: input, shape index: {}]   ;;  %s2646_s2 = inlined_call_operand.hbm [shape: f32[4,128,128], index: 2, kind: input, shape index: {}]   ;;  %s2647_s3 = inlined_call_operand.hbm [shape: f32[1,1,256], index: 3, kind: output, shape index: {}]  }
   0x1   :  { %9 = vsyncpa [#allocation4], 0  ;;  %s2137_s12 = smov [#allocation2]   ;;  %s2089_s16 = scalar_lea.hbm %s2646_s2, 8192 }
   0x2   :  { %s19_s13 = sshll.u32 %s2137_s12, 4  ;;  %p2090_p0 = scmp.ne.s32.totalorder %s2646_s2, %s2089_s16  ;;  %s20_s13 = int_to_ptr.vmem [resolvable:$true] %s19_s13 }
   0x3   :  { %p2093_p1 = scmp.lt.u32.totalorder %s2089_s16, %s2646_s2 }
   0x5   :  { %p2095_p2 = pnand %p2093_p1, %p2090_p0 }
   0x7   :  { %2098 = shalt.err (!%p2095_p2)
}
   0x8   :  { %s2099_s21 = scalar_lea.vmem %s20_s13, 8192  ;;  %p2104_p4 = scmp.lt.s32.totalorder %s20_s13, %s20_s13 }
   0x9   :  { %p2100_p3 = scmp.ne.s32.totalorder %s20_s13, %s2099_s21  ;;  %p2105_p5 = scmp.lt.s32.totalorder %s2099_s21, %s2099_s21 }
   0xb   :  { %p2106_p6 = por %p2105_p5, %p2104_p4 }
   0xd   :  { %p2107_p7 = pnand %p2106_p6, %p2100_p3 }
   0xf   :  { %2110 = shalt.err (!%p2107_p7)
}
  0x10   :  { %s2138_s22 = smov 128   ;;  %s2139_s23 = smov 8  }
  0x11   :  { %25 = dma.hbm_to_vmem [thread:$0]  %s2646_s2, 8192, %s20_s13, [#allocation3], %s2138_s22, %s2138_s22, %s2139_s23  }
  0x12   :  { %2133 = dma.done.wait [#allocation3], 8192  }
  0x13   :  { %2134 = vsyncadd [#allocation3], 4294959104  ;;  %v2140_v0 = vmov 0   ;;  %v2188_v1 = vld [vmem:[%s2645_s1 + $0x10] sm:$0xff]  ;;  %v2193_v2 = vld [vmem:[%s2645_s1] sm:$0xff]  ;;  %v2141_v7 = vmov 5   ;;  %v127_v19 = vlaneseq }
  0x14   :  { %1718 = vset.pattern.permute.xlu0 %v2140_v0  ;;  %1716 = vset.pattern.permute.xlu1 %v2140_v0  ;;  %v2200_v3 = vld [vmem:[%s2645_s1 + $0x30] sm:$0xff]  ;;  %v2205_v4 = vld [vmem:[%s2645_s1 + $0x8] sm:$0xff]  ;;  %v2217_v6 = vld [vmem:[%s2645_s1 + $0x18] sm:$0xff]  ;;  %v2142_v18 = vmov 0.0  }
  0x15   :  { %178 = vperm.xlu0 %1718, %v2188_v1   ;;  %170 = vperm.xlu1 %1716, %v2193_v2   ;;  %v2212_v5 = vld [vmem:[%s2645_s1 + $0x50] sm:$0xff]  ;;  %v2227_v8 = vld [vmem:[%s2645_s1 + $0x20] sm:$0xff]  ;;  %v2235_v9 = vld [vmem:[%s2645_s1 + $0x28] sm:$0xff]  ;;  %v2308_v22 = vshrl.u32 %v127_v19, 7  ;;  %vm1556_vm0 = vcmp.lt.s32.totalorder %v127_v19, 256 }
  0x16   :  { %v2245_v10 = vld [vmem:[%s2645_s1 + $0x48] sm:$0xff]  ;;  %v2250_v11 = vld [vmem:[%s2645_s1 + $0x38] sm:$0xff]  ;;  %v2265_v13 = vld [vmem:[%s2645_s1 + $0x40] sm:$0xff]  ;;  %441 = vmatprep.mubr.f32.mxu0 %v2142_v18  ;;  %715 = vmatprep.mubr.f32.mxu1 %v2142_v18 }
  0x17   :  { %v2260_v12 = vld [vmem:[%s2645_s1 + $0x68] sm:$0xff]  ;;  %v2271_v14 = vld [vmem:[%s2645_s1 + $0x70] sm:$0xff]  ;;  %v2283_v15 = vld [vmem:[%s2645_s1 + $0x58] sm:$0xff]  ;;  %v129_v25 = vsub.s32 0, %v2308_v22  ;;  %v133_v29 = vsub.s32 1, %v2308_v22 }
  0x18   :  { %v2291_v16 = vld [vmem:[%s2645_s1 + $0x60] sm:$0xff]  ;;  %v2300_v17 = vld [vmem:[%s2645_s1 + $0x78] sm:$0xff] }
  0x19   :  { %194 = vperm.xlu0 %1718, %v2200_v3   ;;  %174 = vperm.xlu1 %1716, %v2205_v4   ;;  %v29_v26 = vld [vmem:[%s2644_s0] sm:$0x3] }
  0x1a   :  { %v2319_v30 = vrot.slane %v29_v26, %v129_v25  ;;  %v2321_v32 = vrot.slane %v29_v26, %v133_v29 }
  0x1d   :  { %210 = vperm.xlu0 %1718, %v2212_v5   ;;  %1717 = vset.pattern.permute.xlu1 %v2141_v7 }
  0x1e   :  { %63 = vperm.xlu1 %1717, %v2217_v6  }
  0x21   :  { %1727 = vset.pattern.permute.xlu0 %v2141_v7 }
  0x22   :  { %48 = vperm.xlu0 %1727, %v2193_v2   ;;  %1719 = vset.pattern.permute.xlu1 %v2140_v0 }
  0x23   :  { %182 = vperm.xlu1 %1719, %v2217_v6  }
  0x26   :  { %53 = vperm.xlu0 %1727, %v2205_v4  }
  0x27   :  { %1720 = vset.pattern.permute.xlu1 %v2141_v7 }
  0x28   :  { %68 = vperm.xlu1 %1720, %v2227_v8  }
  0x2a   :  { %58 = vperm.xlu0 %1727, %v2188_v1  }
  0x2c   :  { %1721 = vset.pattern.permute.xlu1 %v2140_v0 }
  0x2d   :  { %186 = vperm.xlu1 %1721, %v2227_v8  }
  0x2e   :  { %73 = vperm.xlu0 %1727, %v2235_v9  }
  0x31   :  { %190 = vperm.xlu1 %1721, %v2235_v9  }
  0x32   :  { %78 = vperm.xlu0 %1727, %v2200_v3  }
  0x35   :  { %1722 = vset.pattern.permute.xlu1 %v2141_v7 }
  0x36   :  { %93 = vperm.xlu0 %1727, %v2245_v10   ;;  %83 = vperm.xlu1 %1722, %v2250_v11  }
  0x3a   :  { %98 = vperm.xlu0 %1727, %v2212_v5   ;;  %1723 = vset.pattern.permute.xlu1 %v2140_v0 }
  0x3b   :  { %198 = vperm.xlu1 %1723, %v2250_v11  }
  0x3e   :  { %113 = vperm.xlu0 %1727, %v2260_v12  }
  0x3f   :  { %1724 = vset.pattern.permute.xlu1 %v2141_v7 }
  0x40   :  { %88 = vperm.xlu1 %1724, %v2265_v13  }
  0x42   :  { %118 = vperm.xlu0 %1727, %v2271_v14  }
  0x44   :  { %1725 = vset.pattern.permute.xlu1 %v2140_v0 }
  0x45   :  { %202 = vperm.xlu1 %1725, %v2265_v13  }
  0x46   :  { %1732 = vset.pattern.permute.xlu0 %v2140_v0 }
  0x47   :  { %226 = vperm.xlu0 %1732, %v2271_v14  }
  0x49   :  { %206 = vperm.xlu1 %1725, %v2245_v10  }
  0x4d   :  { %1726 = vset.pattern.permute.xlu1 %v2141_v7 }
  0x4e   :  { %103 = vperm.xlu1 %1726, %v2283_v15  }
  0x52   :  { %1728 = vset.pattern.permute.xlu1 %v2140_v0 }
  0x53   :  { %214 = vperm.xlu1 %1728, %v2283_v15  }
  0x57   :  { %1729 = vset.pattern.permute.xlu1 %v2141_v7 }
  0x58   :  { %108 = vperm.xlu1 %1729, %v2291_v16  }
  0x5c   :  { %1730 = vset.pattern.permute.xlu1 %v2140_v0 }
  0x5d   :  { %218 = vperm.xlu1 %1730, %v2291_v16  }
  0x61   :  { %222 = vperm.xlu1 %1730, %v2260_v12  }
  0x65   :  { %1731 = vset.pattern.permute.xlu1 %v2141_v7 }
  0x66   :  { %123 = vperm.xlu1 %1731, %v2300_v17  }
  0x6a   :  { %1733 = vset.pattern.permute.xlu1 %v2140_v0 }
  0x6b   :  { %230 = vperm.xlu1 %1733, %v2300_v17  }
  0x94   :  { %v171_v20 = vpop.permute.xlu1 %170  ;;  %v179_v21 = vpop.permute.xlu0 %178 }
  0x98   :  { %v175_v23 = vpop.permute.xlu1 %174  ;;  %v2310_v24 = vpop.permute.xlu0 %194 }
  0x9c   :  { %v2316_v27 = vpop.permute.xlu0 %210 }
  0x9d   :  { %v64_v28 = vpop.permute.xlu1 %63 }
  0x9e   :  { %v143_v33 = vmul.f32 %v2319_v30, %v64_v28  ;;  %v144_v42 = vmul.f32 %v2321_v32, %v64_v28 }
  0xa1   :  { %v49_v31 = vpop.permute.xlu0 %48 }
  0xa2   :  { %v137_v34 = vmul.f32 %v2319_v30, %v49_v31  ;;  %v183_v35 = vpop.permute.xlu1 %182  ;;  %v138_v36 = vmul.f32 %v2321_v32, %v49_v31 }
  0xa3   :  { %v239_v37 = vadd.f32 %v183_v35, %v143_v33  ;;  %v240_v47 = vadd.f32 %v183_v35, %v144_v42 }
  0xa4   :  { %v233_v38 = vadd.f32 %v171_v20, %v137_v34  ;;  %v234_v44 = vadd.f32 %v171_v20, %v138_v36 }
  0xa5   :  { %v54_v39 = vpop.permute.xlu0 %53  ;;  %1753 = vtanh.f32 %v239_v37 }
  0xa6   :  { %v139_v40 = vmul.f32 %v2319_v30, %v54_v39  ;;  %v140_v41 = vmul.f32 %v2321_v32, %v54_v39  ;;  %1755 = vtanh.f32 %v233_v38 }
  0xa7   :  { %v69_v43 = vpop.permute.xlu1 %68 }
  0xa8   :  { %v235_v45 = vadd.f32 %v175_v23, %v139_v40  ;;  %v236_v46 = vadd.f32 %v175_v23, %v140_v41  ;;  %v145_v51 = vmul.f32 %v2319_v30, %v69_v43  ;;  %v146_v52 = vmul.f32 %v2321_v32, %v69_v43 }
  0xa9   :  { %v59_v48 = vpop.permute.xlu0 %58 }
  0xaa   :  { %1757 = vtanh.f32 %v235_v45  ;;  %v141_v49 = vmul.f32 %v2319_v30, %v59_v48  ;;  %v142_v50 = vmul.f32 %v2321_v32, %v59_v48  ;;  %v2143_v48 = vmov 1  }
  0xab   :  { %1759 = vtanh.f32 %v236_v46  ;;  %1734 = vset.pattern.permute.xlu1 %v2143_v48  ;;  %1735 = vset.pattern.permute.xlu0 %v2143_v48 }
  0xac   :  { %1761 = vtanh.f32 %v234_v44  ;;  %v237_v53 = vadd.f32 %v179_v21, %v141_v49  ;;  %v238_v54 = vadd.f32 %v179_v21, %v142_v50  ;;  %v187_v55 = vpop.permute.xlu1 %186  ;;  %314 = vperm.xlu1 %1734, %v2193_v2   ;;  %318 = vperm.xlu0 %1735, %v2205_v4  }
  0xad   :  { %1763 = vtanh.f32 %v240_v47  ;;  %v241_v56 = vadd.f32 %v187_v55, %v145_v51  ;;  %v74_v57 = vpop.permute.xlu0 %73  ;;  %v242_v58 = vadd.f32 %v187_v55, %v146_v52 }
  0xae   :  { %1765 = vtanh.f32 %v237_v53  ;;  %v147_v59 = vmul.f32 %v2319_v30, %v74_v57  ;;  %v148_v60 = vmul.f32 %v2321_v32, %v74_v57 }
  0xaf   :  { %1767 = vtanh.f32 %v238_v54  ;;  %v1754_v0 = vpop.eup %1753 }
  0xb0   :  { %v191_v61 = vpop.permute.xlu1 %190  ;;  %1769 = vtanh.f32 %v241_v56  ;;  %v1756_v7 = vpop.eup %1755  ;;  %322 = vperm.xlu1 %1734, %v2188_v1   ;;  %330 = vperm.xlu0 %1735, %v2227_v8  }
  0xb1   :  { %v243_v62 = vadd.f32 %v191_v61, %v147_v59  ;;  %v244_v63 = vadd.f32 %v191_v61, %v148_v60  ;;  %1771 = vtanh.f32 %v242_v58  ;;  %v79_v23 = vpop.permute.xlu0 %78 }
  0xb2   :  { %v149_v28 = vmul.f32 %v2319_v30, %v79_v23  ;;  %v150_v33 = vmul.f32 %v2321_v32, %v79_v23 }
  0xb3   :  { %1773 = vtanh.f32 %v243_v62 }
  0xb4   :  { %v1758_v20 = vpop.eup %1757  ;;  %1775 = vtanh.f32 %v244_v63  ;;  %v245_v38 = vadd.f32 %v2310_v24, %v149_v28  ;;  %v246_v44 = vadd.f32 %v2310_v24, %v150_v33  ;;  %326 = vperm.xlu1 %1734, %v2217_v6   ;;  %338 = vperm.xlu0 %1735, %v2200_v3  }
  0xb5   :  { %v1760_v21 = vpop.eup %1759  ;;  %v84_v25 = vpop.permute.xlu1 %83  ;;  %v1576_v29 = vpack.c.bf16 %v1758_v20, %v1756_v7 }
  0xb6   :  { %v1762_v26 = vpop.eup %1761  ;;  %v151_v37 = vmul.f32 %v2319_v30, %v84_v25  ;;  %v152_v39 = vmul.f32 %v2321_v32, %v84_v25  ;;  %v94_v53 = vpop.permute.xlu0 %93 }
  0xb7   :  { %v1764_v31 = vpop.eup %1763  ;;  %v1574_v34 = vpack.c.bf16 %v1760_v21, %v1762_v26  ;;  %v155_v57 = vmul.f32 %v2319_v30, %v94_v53  ;;  %v156_v58 = vmul.f32 %v2321_v32, %v94_v53 }
  0xb8   :  { %v1766_v35 = vpop.eup %1765  ;;  %334 = vperm.xlu1 %1734, %v2235_v9   ;;  %346 = vperm.xlu0 %1735, %v2265_v13  }
  0xb9   :  { %v1768_v36 = vpop.eup %1767  ;;  %1575 = vmatprep.subr.bf16.mxu0 %v1574_v34  ;;  %v1580_v42 = vpack.c.bf16 %v1754_v0, %v1766_v35 }
  0xba   :  { %1577 = vmatpush1.bf16.msra.mxu0 %v1576_v29  ;;  %v199_v40 = vpop.permute.xlu1 %198  ;;  %v1578_v41 = vpack.c.bf16 %v1764_v31, %v1768_v36  ;;  %v1770_v43 = vpop.eup %1769 }
  0xbb   :  { %v247_v45 = vadd.f32 %v199_v40, %v151_v37  ;;  %v1772_v46 = vpop.eup %1771  ;;  %v248_v47 = vadd.f32 %v199_v40, %v152_v39  ;;  %v99_v63 = vpop.permute.xlu0 %98 }
  0xbc   :  { %1579 = vmatprep.subr.bf16.mxu0 %v1578_v41  ;;  %v157_v26 = vmul.f32 %v2319_v30, %v99_v63  ;;  %v158_v29 = vmul.f32 %v2321_v32, %v99_v63  ;;  %342 = vperm.xlu1 %1734, %v2250_v11  }
  0xbd   :  { %v1774_v49 = vpop.eup %1773  ;;  %1777 = vtanh.f32 %v247_v45  ;;  %354 = vperm.xlu0 %1735, %v2212_v5  }
  0xbe   :  { %v1776_v50 = vpop.eup %1775  ;;  %1779 = vtanh.f32 %v245_v38  ;;  %1581 = vmatpush1.bf16.msra.mxu0 %v1580_v42  ;;  %v1584_v51 = vpack.c.bf16 %v1774_v49, %v1770_v43  ;;  %v253_v33 = vadd.f32 %v2316_v27, %v157_v26  ;;  %v254_v34 = vadd.f32 %v2316_v27, %v158_v29 }
  0xbf   :  { %1781 = vtanh.f32 %v246_v44  ;;  %v89_v52 = vpop.permute.xlu1 %88  ;;  %v1582_v24 = vpack.c.bf16 %v1776_v50, %v1772_v46  ;;  %v114_v46 = vpop.permute.xlu0 %113 }
  0xc0   :  { %1783 = vtanh.f32 %v248_v47  ;;  %v153_v54 = vmul.f32 %v2319_v30, %v89_v52  ;;  %v154_v55 = vmul.f32 %v2321_v32, %v89_v52  ;;  %350 = vperm.xlu1 %1734, %v2245_v10  }
  0xc1   :  { %1583 = vmatprep.subr.bf16.mxu0 %v1582_v24  ;;  %362 = vperm.xlu0 %1735, %v2291_v16  }
  0xc2   :  { %1585 = vmatpush1.bf16.msra.mxu0 %v1584_v51 }
  0xc3   :  { %v119_v24 = vpop.permute.xlu0 %118 }
  0xc4   :  { %v203_v56 = vpop.permute.xlu1 %202  ;;  %358 = vperm.xlu1 %1734, %v2283_v15   ;;  %v165_v63 = vmul.f32 %v2319_v30, %v119_v24 }
  0xc5   :  { %v249_v59 = vadd.f32 %v203_v56, %v153_v54  ;;  %v250_v60 = vadd.f32 %v203_v56, %v154_v55  ;;  %370 = vperm.xlu0 %1735, %v2271_v14   ;;  %v163_v55 = vmul.f32 %v2319_v30, %v114_v46  ;;  %v164_v56 = vmul.f32 %v2321_v32, %v114_v46  ;;  %v301_v46 = vld [vmem:[#allocation2 + $0x20] sm:$0xff] }
  0xc7   :  { %v1778_v61 = vpop.eup %1777  ;;  %1785 = vtanh.f32 %v249_v59 }
  0xc8   :  { %v1780_v62 = vpop.eup %1779  ;;  %v207_v0 = vpop.permute.xlu1 %206  ;;  %1787 = vtanh.f32 %v250_v60  ;;  %366 = vperm.xlu1 %1734, %v2260_v12  }
  0xc9   :  { %v1782_v7 = vpop.eup %1781  ;;  %v251_v20 = vadd.f32 %v207_v0, %v155_v57  ;;  %v252_v21 = vadd.f32 %v207_v0, %v156_v58  ;;  %v1588_v25 = vpack.c.bf16 %v1778_v61, %v1780_v62  ;;  %v166_v0 = vmul.f32 %v2321_v32, %v119_v24  ;;  %v308_v24 = vld [vmem:[#allocation2 + $0x58] sm:$0xff] }
  0xca   :  { %v1784_v23 = vpop.eup %1783 }
  0xcb   :  { %1789 = vtanh.f32 %v251_v20  ;;  %v1586_v28 = vpack.c.bf16 %v1784_v23, %v1782_v7  ;;  %v227_v7 = vpop.permute.xlu0 %226 }
  0xcc   :  { %1791 = vtanh.f32 %v252_v21  ;;  %374 = vperm.xlu1 %1734, %v2300_v17   ;;  %v261_v21 = vadd.f32 %v227_v7, %v165_v63  ;;  %v262_v23 = vadd.f32 %v227_v7, %v166_v0 }
  0xcd   :  { %1587 = vmatprep.subr.bf16.mxu0 %v1586_v28  ;;  %v104_v31 = vpop.permute.xlu1 %103  ;;  %1793 = vtanh.f32 %v253_v33 }
  0xce   :  { %1589 = vmatpush1.bf16.msra.mxu0 %v1588_v25  ;;  %v159_v35 = vmul.f32 %v2319_v30, %v104_v31  ;;  %v160_v36 = vmul.f32 %v2321_v32, %v104_v31  ;;  %1795 = vtanh.f32 %v254_v34 }
  0xd1   :  { %v1786_v38 = vpop.eup %1785 }
  0xd2   :  { %v215_v37 = vpop.permute.xlu1 %214  ;;  %v1788_v41 = vpop.eup %1787 }
  0xd3   :  { %v255_v39 = vadd.f32 %v215_v37, %v159_v35  ;;  %v256_v40 = vadd.f32 %v215_v37, %v160_v36 }
  0xd5   :  { %v1790_v42 = vpop.eup %1789  ;;  %1797 = vtanh.f32 %v255_v39 }
  0xd6   :  { %v1792_v27 = vpop.eup %1791  ;;  %1799 = vtanh.f32 %v256_v40  ;;  %v1592_v43 = vpack.c.bf16 %v1790_v42, %v1786_v38 }
  0xd7   :  { %v109_v44 = vpop.permute.xlu1 %108  ;;  %v1590_v45 = vpack.c.bf16 %v1792_v27, %v1788_v41  ;;  %v1794_v50 = vpop.eup %1793  ;;  %v297_v27 = vld [vmem:[#allocation2] sm:$0xff] }
  0xd8   :  { %v161_v47 = vmul.f32 %v2319_v30, %v109_v44  ;;  %v162_v48 = vmul.f32 %v2321_v32, %v109_v44  ;;  %v1796_v52 = vpop.eup %1795  ;;  %v299_v44 = vld [vmem:[#allocation2 + $0x10] sm:$0xff] }
  0xd9   :  { %1591 = vmatprep.subr.bf16.mxu0 %v1590_v45  ;;  %v300_v45 = vld [vmem:[#allocation2 + $0x18] sm:$0xff] }
  0xda   :  { %1593 = vmatpush1.bf16.msra.mxu0 %v1592_v43  ;;  %v298_v43 = vld [vmem:[#allocation2 + $0x8] sm:$0xff] }
  0xdc   :  { %v219_v49 = vpop.permute.xlu1 %218 }
  0xdd   :  { %v257_v51 = vadd.f32 %v219_v49, %v161_v47  ;;  %v258_v53 = vadd.f32 %v219_v49, %v162_v48  ;;  %v302_v47 = vld [vmem:[#allocation2 + $0x28] sm:$0xff]  ;;  %v303_v48 = vld [vmem:[#allocation2 + $0x30] sm:$0xff]  ;;  %v304_v49 = vld [vmem:[#allocation2 + $0x38] sm:$0xff] }
  0xdf   :  { %v1798_v54 = vpop.eup %1797  ;;  %1801 = vtanh.f32 %v257_v51  ;;  %v306_v51 = vld [vmem:[#allocation2 + $0x48] sm:$0xff] }
  0xe0   :  { %v1800_v57 = vpop.eup %1799  ;;  %v223_v58 = vpop.permute.xlu1 %222  ;;  %v1596_v59 = vpack.c.bf16 %v1798_v54, %v1794_v50  ;;  %1803 = vtanh.f32 %v258_v53  ;;  %v305_v50 = vld [vmem:[#allocation2 + $0x40] sm:$0xff]  ;;  %v310_v54 = vld [vmem:[#allocation2 + $0x68] sm:$0xff] }
  0xe1   :  { %v259_v60 = vadd.f32 %v223_v58, %v163_v55  ;;  %v260_v61 = vadd.f32 %v223_v58, %v164_v56  ;;  %v1594_v62 = vpack.c.bf16 %v1800_v57, %v1796_v52  ;;  %v307_v52 = vld [vmem:[#allocation2 + $0x50] sm:$0xff]  ;;  %v309_v53 = vld [vmem:[#allocation2 + $0x60] sm:$0xff]  ;;  %v312_v56 = vld [vmem:[#allocation2 + $0x78] sm:$0xff] }
  0xe2   :  { %v311_v55 = vld [vmem:[#allocation2 + $0x70] sm:$0xff] }
  0xe3   :  { %1805 = vtanh.f32 %v259_v60  ;;  %1595 = vmatprep.subr.bf16.mxu0 %v1594_v62 }
  0xe4   :  { %1807 = vtanh.f32 %v260_v61  ;;  %1597 = vmatpush1.bf16.msra.mxu0 %v1596_v59 }
  0xe5   :  { %v124_v20 = vpop.permute.xlu1 %123  ;;  %1809 = vtanh.f32 %v261_v21 }
  0xe6   :  { %v167_v25 = vmul.f32 %v2319_v30, %v124_v20  ;;  %v168_v26 = vmul.f32 %v2321_v32, %v124_v20  ;;  %1811 = vtanh.f32 %v262_v23 }
  0xe9   :  { %v1802_v29 = vpop.eup %1801 }
  0xea   :  { %v231_v28 = vpop.permute.xlu1 %230  ;;  %v1804_v34 = vpop.eup %1803 }
  0xeb   :  { %v263_v31 = vadd.f32 %v231_v28, %v167_v25  ;;  %v264_v33 = vadd.f32 %v231_v28, %v168_v26 }
  0xed   :  { %v1806_v35 = vpop.eup %1805  ;;  %1813 = vtanh.f32 %v263_v31 }
  0xee   :  { %v1808_v36 = vpop.eup %1807  ;;  %1815 = vtanh.f32 %v264_v33  ;;  %v1600_v37 = vpack.c.bf16 %v1806_v35, %v1802_v29  ;;  %v2144_v29 = vmov 2  }
  0xef   :  { %v1598_v38 = vpack.c.bf16 %v1808_v36, %v1804_v34  ;;  %v1810_v39 = vpop.eup %1809  ;;  %1736 = vset.pattern.permute.xlu0 %v2144_v29  ;;  %1737 = vset.pattern.permute.xlu1 %v2144_v29 }
  0xf0   :  { %v1812_v40 = vpop.eup %1811  ;;  %588 = vperm.xlu0 %1736, %v2193_v2   ;;  %592 = vperm.xlu1 %1737, %v2205_v4  }
  0xf1   :  { %1599 = vmatprep.subr.bf16.mxu0 %v1598_v38 }
  0xf2   :  { %1601 = vmatpush1.bf16.msra.mxu0 %v1600_v37 }
  0xf4   :  { %600 = vperm.xlu0 %1736, %v2217_v6   ;;  %596 = vperm.xlu1 %1737, %v2188_v1  }
  0xf7   :  { %v1814_v30 = vpop.eup %1813 }
  0xf8   :  { %v1816_v41 = vpop.eup %1815  ;;  %v1604_v32 = vpack.c.bf16 %v1814_v30, %v1810_v39  ;;  %608 = vperm.xlu0 %1736, %v2235_v9   ;;  %604 = vperm.xlu1 %1737, %v2227_v8  }
  0xf9   :  { %v1602_v42 = vpack.c.bf16 %v1816_v41, %v1812_v40 }
  0xfb   :  { %1603 = vmatprep.subr.bf16.mxu0 %v1602_v42 }
  0xfc   :  { %1605 = vmatpush1.bf16.msra.mxu0 %v1604_v32  ;;  %616 = vperm.xlu0 %1736, %v2250_v11  }
  0xfd   :  { %612 = vperm.xlu1 %1737, %v2200_v3  }
  0xff   :  { %442 = vmatmul.mubr.f32.vlgmr.msra.gmra.mrb[0].mxu0 %v297_v27 }
 0x100   :  { %447 = vmatprep.mubr.f32.mxu0 %v2142_v18  ;;  %624 = vperm.xlu0 %1736, %v2245_v10  }
 0x101   :  { %620 = vperm.xlu1 %1737, %v2265_v13  }
 0x103   :  { %448 = vmatmul.mubr.f32.gmra.mrb[2].mxu0 %v298_v43 }
 0x104   :  { %453 = vmatprep.mubr.f32.mxu0 %v2142_v18  ;;  %632 = vperm.xlu0 %1736, %v2283_v15  }
 0x105   :  { %628 = vperm.xlu1 %1737, %v2212_v5  }
 0x107   :  { %454 = vmatmul.mubr.f32.gmra.mrb[4].mxu0 %v299_v44 }
 0x108   :  { %459 = vmatprep.mubr.f32.mxu0 %v2142_v18  ;;  %640 = vperm.xlu0 %1736, %v2260_v12  }
 0x109   :  { %636 = vperm.xlu1 %1737, %v2291_v16  }
 0x10b   :  { %460 = vmatmul.mubr.f32.gmra.mrb[6].mxu0 %v300_v45 }
 0x10c   :  { %465 = vmatprep.mubr.f32.mxu0 %v2142_v18  ;;  %648 = vperm.xlu0 %1736, %v2300_v17  }
 0x10d   :  { %644 = vperm.xlu1 %1737, %v2271_v14  }
 0x10f   :  { %466 = vmatmul.mubr.f32.gmra.mrb[8].mxu0 %v301_v46 }
 0x110   :  { %471 = vmatprep.mubr.f32.mxu0 %v2142_v18 }
 0x113   :  { %472 = vmatmul.mubr.f32.gmra.mrb[10].mxu0 %v302_v47 }
 0x114   :  { %477 = vmatprep.mubr.f32.mxu0 %v2142_v18 }
 0x117   :  { %478 = vmatmul.mubr.f32.gmra.mrb[12].mxu0 %v303_v48 }
 0x118   :  { %483 = vmatprep.mubr.f32.mxu0 %v2142_v18 }
 0x11b   :  { %484 = vmatmul.mubr.f32.gmra.mrb[14].mxu0 %v304_v49 }
 0x11c   :  { %489 = vmatprep.mubr.f32.mxu0 %v2142_v18 }
 0x11f   :  { %490 = vmatmul.mubr.f32.gmra.mrb[16].mxu0 %v305_v50 }
 0x120   :  { %495 = vmatprep.mubr.f32.mxu0 %v2142_v18 }
 0x123   :  { %496 = vmatmul.mubr.f32.gmra.mrb[18].mxu0 %v306_v51 }
 0x124   :  { %501 = vmatprep.mubr.f32.mxu0 %v2142_v18 }
 0x127   :  { %502 = vmatmul.mubr.f32.gmra.mrb[20].mxu0 %v307_v52 }
 0x128   :  { %507 = vmatprep.mubr.f32.mxu0 %v2142_v18 }
 0x12b   :  { %508 = vmatmul.mubr.f32.gmra.mrb[22].mxu0 %v308_v24  ;;  %v315_v57 = vpop.permute.xlu1 %314  ;;  %v319_v62 = vpop.permute.xlu0 %318 }
 0x12c   :  { %513 = vmatprep.mubr.f32.mxu0 %v2142_v18 }
 0x12f   :  { %514 = vmatmul.mubr.f32.gmra.mrb[24].mxu0 %v309_v53  ;;  %v323_v20 = vpop.permute.xlu1 %322  ;;  %v331_v39 = vpop.permute.xlu0 %330 }
 0x130   :  { %519 = vmatprep.mubr.f32.mxu0 %v2142_v18 }
 0x133   :  { %520 = vmatmul.mubr.f32.gmra.mrb[26].mxu0 %v310_v54  ;;  %v327_v31 = vpop.permute.xlu1 %326  ;;  %v339_v48 = vpop.permute.xlu0 %338 }
 0x134   :  { %525 = vmatprep.mubr.f32.mxu0 %v2142_v18 }
 0x137   :  { %526 = vmatmul.mubr.f32.gmra.mrb[28].mxu0 %v311_v55  ;;  %v335_v43 = vpop.permute.xlu1 %334 }
 0x138   :  { %531 = vmatprep.mubr.f32.mxu0 %v2142_v18 }
 0x13b   :  { %532 = vmatmul.mubr.f32.gmra.mrb[30].mxu0 %v312_v56  ;;  %v343_v54 = vpop.permute.xlu1 %342 }
 0x13c   :  { %989 = vmatprep.mubr.f32.mxu0 %v2142_v18 }
 0x1d2   :  { %v443_v58 = vpop.f32.mrb[0].mxu0 }
 0x1d3   :  { %v444_v59 = vadd.f32 %v443_v58, %v315_v57  ;;  %v445_v60 = vpop.f32.mrb[1].mxu0 }
 0x1d4   :  { %v446_v61 = vadd.f32 %v445_v60, %v315_v57 }
 0x1d5   :  { %1817 = vtanh.f32 %v444_v59  ;;  %v347_v59 = vpop.permute.xlu0 %346 }
 0x1d6   :  { %v449_v63 = vpop.f32.mrb[2].mxu0  ;;  %1819 = vtanh.f32 %v446_v61 }
 0x1d7   :  { %v450_v0 = vadd.f32 %v449_v63, %v319_v62  ;;  %v451_v7 = vpop.f32.mrb[3].mxu0 }
 0x1d8   :  { %v452_v21 = vadd.f32 %v451_v7, %v319_v62 }
 0x1d9   :  { %1821 = vtanh.f32 %v450_v0 }
 0x1da   :  { %1823 = vtanh.f32 %v452_v21  ;;  %v455_v23 = vpop.f32.mrb[4].mxu0 }
 0x1db   :  { %v456_v25 = vadd.f32 %v455_v23, %v323_v20  ;;  %v457_v26 = vpop.f32.mrb[5].mxu0 }
 0x1dc   :  { %v458_v28 = vadd.f32 %v457_v26, %v323_v20  ;;  %v351_v20 = vpop.permute.xlu1 %350 }
 0x1dd   :  { %1825 = vtanh.f32 %v456_v25 }
 0x1de   :  { %v461_v33 = vpop.f32.mrb[6].mxu0  ;;  %1827 = vtanh.f32 %v458_v28  ;;  %v355_v28 = vpop.permute.xlu0 %354 }
 0x1df   :  { %v462_v34 = vadd.f32 %v461_v33, %v327_v31  ;;  %v463_v35 = vpop.f32.mrb[7].mxu0  ;;  %v1818_v37 = vpop.eup %1817 }
 0x1e0   :  { %v464_v36 = vadd.f32 %v463_v35, %v327_v31  ;;  %v1820_v38 = vpop.eup %1819 }
 0x1e1   :  { %1829 = vtanh.f32 %v462_v34 }
 0x1e2   :  { %1831 = vtanh.f32 %v464_v36  ;;  %v467_v40 = vpop.f32.mrb[8].mxu0  ;;  %v363_v14 = vpop.permute.xlu0 %362 }
 0x1e3   :  { %v1822_v30 = vpop.eup %1821  ;;  %v468_v41 = vadd.f32 %v467_v40, %v331_v39  ;;  %v469_v2 = vpop.f32.mrb[9].mxu0 }
 0x1e4   :  { %v1824_v32 = vpop.eup %1823  ;;  %v470_v4 = vadd.f32 %v469_v2, %v331_v39  ;;  %v1608_v42 = vpack.c.bf16 %v1822_v30, %v1818_v37  ;;  %v359_v37 = vpop.permute.xlu1 %358 }
 0x1e5   :  { %v1606_v27 = vpack.c.bf16 %v1824_v32, %v1820_v38  ;;  %1833 = vtanh.f32 %v468_v41 }
 0x1e6   :  { %v473_v44 = vpop.f32.mrb[10].mxu0  ;;  %1835 = vtanh.f32 %v470_v4 }
 0x1e7   :  { %v474_v45 = vadd.f32 %v473_v44, %v335_v43  ;;  %v475_v46 = vpop.f32.mrb[11].mxu0  ;;  %1607 = vmatprep.subr.bf16.mxu1 %v1606_v27  ;;  %v1826_v1 = vpop.eup %1825 }
 0x1e8   :  { %v476_v6 = vadd.f32 %v475_v46, %v335_v43  ;;  %1609 = vmatpush1.bf16.msra.mxu1 %v1608_v42  ;;  %v1828_v47 = vpop.eup %1827  ;;  %v367_v46 = vpop.permute.xlu1 %366 }
 0x1e9   :  { %1837 = vtanh.f32 %v474_v45 }
 0x1ea   :  { %1839 = vtanh.f32 %v476_v6  ;;  %v479_v49 = vpop.f32.mrb[12].mxu0 }
 0x1eb   :  { %v1830_v9 = vpop.eup %1829  ;;  %v480_v50 = vadd.f32 %v479_v49, %v339_v48  ;;  %v481_v8 = vpop.f32.mrb[13].mxu0 }
 0x1ec   :  { %v1832_v51 = vpop.eup %1831  ;;  %v482_v52 = vadd.f32 %v481_v8, %v339_v48  ;;  %v1612_v24 = vpack.c.bf16 %v1830_v9, %v1826_v1 }
 0x1ed   :  { %v1610_v53 = vpack.c.bf16 %v1832_v51, %v1828_v47  ;;  %1841 = vtanh.f32 %v480_v50  ;;  %v371_v50 = vpop.permute.xlu0 %370 }
 0x1ee   :  { %v485_v55 = vpop.f32.mrb[14].mxu0  ;;  %1843 = vtanh.f32 %v482_v52 }
 0x1ef   :  { %v486_v56 = vadd.f32 %v485_v55, %v343_v54  ;;  %v487_v57 = vpop.f32.mrb[15].mxu0  ;;  %1611 = vmatprep.subr.bf16.mxu1 %v1610_v53  ;;  %v1834_v3 = vpop.eup %1833 }
 0x1f0   :  { %v488_v11 = vadd.f32 %v487_v57, %v343_v54  ;;  %1613 = vmatpush1.bf16.msra.mxu1 %v1612_v24  ;;  %v1836_v58 = vpop.eup %1835  ;;  %v375_v57 = vpop.permute.xlu1 %374 }
 0x1f1   :  { %1845 = vtanh.f32 %v486_v56 }
 0x1f2   :  { %1847 = vtanh.f32 %v488_v11  ;;  %v491_v60 = vpop.f32.mrb[16].mxu0 }
 0x1f3   :  { %v1838_v10 = vpop.eup %1837  ;;  %v492_v61 = vadd.f32 %v491_v60, %v347_v59  ;;  %v493_v13 = vpop.f32.mrb[17].mxu0 }
 0x1f4   :  { %v1840_v62 = vpop.eup %1839  ;;  %v494_v63 = vadd.f32 %v493_v13, %v347_v59  ;;  %v1616_v0 = vpack.c.bf16 %v1838_v10, %v1834_v3 }
 0x1f5   :  { %v1614_v7 = vpack.c.bf16 %v1840_v62, %v1836_v58  ;;  %1849 = vtanh.f32 %v492_v61 }
 0x1f6   :  { %v497_v21 = vpop.f32.mrb[18].mxu0  ;;  %1851 = vtanh.f32 %v494_v63 }
 0x1f7   :  { %v498_v23 = vadd.f32 %v497_v21, %v351_v20  ;;  %v499_v25 = vpop.f32.mrb[19].mxu0  ;;  %1615 = vmatprep.subr.bf16.mxu1 %v1614_v7  ;;  %v1842_v5 = vpop.eup %1841 }
 0x1f8   :  { %v500_v15 = vadd.f32 %v499_v25, %v351_v20  ;;  %1617 = vmatpush1.bf16.msra.mxu1 %v1616_v0  ;;  %v1844_v26 = vpop.eup %1843 }
 0x1f9   :  { %1853 = vtanh.f32 %v498_v23 }
 0x1fa   :  { %1855 = vtanh.f32 %v500_v15  ;;  %v503_v29 = vpop.f32.mrb[20].mxu0  ;;  %v571_v15 = vld [vmem:[#allocation2 + $0x80] sm:$0xff] }
 0x1fb   :  { %v1846_v12 = vpop.eup %1845  ;;  %v504_v31 = vadd.f32 %v503_v29, %v355_v28  ;;  %v505_v16 = vpop.f32.mrb[21].mxu0  ;;  %v575_v29 = vld [vmem:[#allocation2 + $0xa0] sm:$0xff] }
 0x1fc   :  { %v1848_v33 = vpop.eup %1847  ;;  %v506_v34 = vadd.f32 %v505_v16, %v355_v28  ;;  %v1620_v35 = vpack.c.bf16 %v1846_v12, %v1842_v5  ;;  %v572_v5 = vld [vmem:[#allocation2 + $0x88] sm:$0xff]  ;;  %v574_v28 = vld [vmem:[#allocation2 + $0x98] sm:$0xff] }
 0x1fd   :  { %v1618_v36 = vpack.c.bf16 %v1848_v33, %v1844_v26  ;;  %1857 = vtanh.f32 %v504_v31  ;;  %v573_v26 = vld [vmem:[#allocation2 + $0x90] sm:$0xff]  ;;  %v576_v12 = vld [vmem:[#allocation2 + $0xa8] sm:$0xff]  ;;  %v578_v16 = vld [vmem:[#allocation2 + $0xb8] sm:$0xff] }
 0x1fe   :  { %v509_v38 = vpop.f32.mrb[22].mxu0  ;;  %1859 = vtanh.f32 %v506_v34  ;;  %v577_v31 = vld [vmem:[#allocation2 + $0xb0] sm:$0xff]  ;;  %v579_v33 = vld [vmem:[#allocation2 + $0xc0] sm:$0xff]  ;;  %v580_v34 = vld [vmem:[#allocation2 + $0xc8] sm:$0xff] }
 0x1ff   :  { %v510_v39 = vadd.f32 %v509_v38, %v359_v37  ;;  %v511_v40 = vpop.f32.mrb[23].mxu0  ;;  %1619 = vmatprep.subr.bf16.mxu1 %v1618_v36  ;;  %v1850_v41 = vpop.eup %1849  ;;  %v582_v36 = vld [vmem:[#allocation2 + $0xd8] sm:$0xff]  ;;  %v584_v38 = vld [vmem:[#allocation2 + $0xe8] sm:$0xff] }
 0x200   :  { %v512_v30 = vadd.f32 %v511_v40, %v359_v37  ;;  %1621 = vmatpush1.bf16.msra.mxu1 %v1620_v35  ;;  %v1852_v17 = vpop.eup %1851  ;;  %v581_v35 = vld [vmem:[#allocation2 + $0xd0] sm:$0xff]  ;;  %v583_v37 = vld [vmem:[#allocation2 + $0xe0] sm:$0xff]  ;;  %v586_v40 = vld [vmem:[#allocation2 + $0xf8] sm:$0xff] }
 0x201   :  { %1861 = vtanh.f32 %v510_v39  ;;  %v585_v39 = vld [vmem:[#allocation2 + $0xf0] sm:$0xff] }
 0x202   :  { %1863 = vtanh.f32 %v512_v30  ;;  %v515_v2 = vpop.f32.mrb[24].mxu0  ;;  %v589_v30 = vpop.permute.xlu0 %588 }
 0x203   :  { %v1854_v32 = vpop.eup %1853  ;;  %v516_v4 = vadd.f32 %v515_v2, %v363_v14  ;;  %v517_v42 = vpop.f32.mrb[25].mxu0 }
 0x204   :  { %v1856_v27 = vpop.eup %1855  ;;  %v518_v43 = vadd.f32 %v517_v42, %v363_v14  ;;  %v1624_v44 = vpack.c.bf16 %v1854_v32, %v1850_v41  ;;  %v593_v41 = vpop.permute.xlu1 %592 }
 0x205   :  { %v1622_v45 = vpack.c.bf16 %v1856_v27, %v1852_v17  ;;  %1865 = vtanh.f32 %v516_v4 }
 0x206   :  { %v521_v6 = vpop.f32.mrb[26].mxu0  ;;  %1867 = vtanh.f32 %v518_v43 }
 0x207   :  { %v522_v1 = vadd.f32 %v521_v6, %v367_v46  ;;  %v523_v47 = vpop.f32.mrb[27].mxu0  ;;  %1623 = vmatprep.subr.bf16.mxu1 %v1622_v45  ;;  %v1858_v49 = vpop.eup %1857  ;;  %v2145_v45 = vmov 3   ;;  %v2426_v6 = vld [vmem:[%s2645_s1] sm:$0xff] }
 0x208   :  { %v524_v48 = vadd.f32 %v523_v47, %v367_v46  ;;  %1625 = vmatpush1.bf16.msra.mxu1 %v1624_v44  ;;  %v1860_v9 = vpop.eup %1859  ;;  %v597_v43 = vpop.permute.xlu1 %596  ;;  %1738 = vset.pattern.permute.xlu1 %v2145_v45 }
 0x209   :  { %1869 = vtanh.f32 %v522_v1  ;;  %1739 = vset.pattern.permute.xlu0 %v2145_v45  ;;  %862 = vperm.xlu1 %1738, %v2426_v6   ;;  %v2432_v1 = vld [vmem:[%s2645_s1 + $0x8] sm:$0xff] }
 0x20a   :  { %1871 = vtanh.f32 %v524_v48  ;;  %v527_v8 = vpop.f32.mrb[28].mxu0  ;;  %866 = vperm.xlu0 %1739, %v2432_v1  }
 0x20b   :  { %v1862_v51 = vpop.eup %1861  ;;  %v528_v52 = vadd.f32 %v527_v8, %v371_v50  ;;  %v529_v24 = vpop.f32.mrb[29].mxu0  ;;  %v2438_v8 = vld [vmem:[%s2645_s1 + $0x10] sm:$0xff] }
 0x20c   :  { %v1864_v53 = vpop.eup %1863  ;;  %v530_v54 = vadd.f32 %v529_v24, %v371_v50  ;;  %v1628_v55 = vpack.c.bf16 %v1862_v51, %v1858_v49  ;;  %v2444_v51 = vld [vmem:[%s2645_s1 + $0x20] sm:$0xff] }
 0x20d   :  { %v1626_v56 = vpack.c.bf16 %v1864_v53, %v1860_v9  ;;  %1873 = vtanh.f32 %v528_v52  ;;  %v601_v9 = vpop.permute.xlu0 %600  ;;  %870 = vperm.xlu1 %1738, %v2438_v8  }
 0x20e   :  { %v533_v11 = vpop.f32.mrb[30].mxu0  ;;  %1875 = vtanh.f32 %v530_v54  ;;  %878 = vperm.xlu0 %1739, %v2444_v51  }
 0x20f   :  { %v534_v3 = vadd.f32 %v533_v11, %v375_v57  ;;  %v535_v58 = vpop.f32.mrb[31].mxu0  ;;  %1627 = vmatprep.subr.bf16.mxu1 %v1626_v56  ;;  %v1866_v60 = vpop.eup %1865  ;;  %v2450_v11 = vld [vmem:[%s2645_s1 + $0x18] sm:$0xff] }
 0x210   :  { %v536_v59 = vadd.f32 %v535_v58, %v375_v57  ;;  %1629 = vmatpush1.bf16.msra.mxu1 %v1628_v55  ;;  %v1868_v10 = vpop.eup %1867  ;;  %v605_v56 = vpop.permute.xlu1 %604 }
 0x211   :  { %1877 = vtanh.f32 %v534_v3  ;;  %874 = vperm.xlu1 %1738, %v2450_v11   ;;  %v2456_v3 = vld [vmem:[%s2645_s1 + $0x30] sm:$0xff] }
 0x212   :  { %1879 = vtanh.f32 %v536_v59  ;;  %886 = vperm.xlu0 %1739, %v2456_v3  }
 0x213   :  { %v1870_v61 = vpop.eup %1869 }
 0x214   :  { %v1872_v13 = vpop.eup %1871  ;;  %v1632_v62 = vpack.c.bf16 %v1870_v61, %v1866_v60 }
 0x215   :  { %v1630_v63 = vpack.c.bf16 %v1872_v13, %v1868_v10 }
 0x217   :  { %1631 = vmatprep.subr.bf16.mxu1 %v1630_v63  ;;  %v1874_v0 = vpop.eup %1873  ;;  %v609_v63 = vpop.permute.xlu0 %608 }
 0x218   :  { %1633 = vmatpush1.bf16.msra.mxu1 %v1632_v62  ;;  %v1876_v7 = vpop.eup %1875 }
 0x21b   :  { %v1878_v20 = vpop.eup %1877 }
 0x21c   :  { %v1880_v21 = vpop.eup %1879  ;;  %v1636_v23 = vpack.c.bf16 %v1878_v20, %v1874_v0  ;;  %v2468_v20 = vld [vmem:[%s2645_s1 + $0x40] sm:$0xff] }
 0x21d   :  { %v1634_v25 = vpack.c.bf16 %v1880_v21, %v1876_v7  ;;  %v2462_v7 = vld [vmem:[%s2645_s1 + $0x28] sm:$0xff]  ;;  %894 = vperm.xlu0 %1739, %v2468_v20  }
 0x21e   :  { %882 = vperm.xlu1 %1738, %v2462_v7  }
 0x21f   :  { %1635 = vmatprep.subr.bf16.mxu1 %v1634_v25 }
 0x220   :  { %1637 = vmatpush1.bf16.msra.mxu1 %v1636_v23 }
 0x223   :  { %716 = vmatmul.mubr.f32.vlgmr.msra.gmra.mrb[0].mxu1 %v571_v15 }
 0x224   :  { %721 = vmatprep.mubr.f32.mxu1 %v2142_v18 }
 0x227   :  { %722 = vmatmul.mubr.f32.gmra.mrb[2].mxu1 %v572_v5 }
 0x228   :  { %727 = vmatprep.mubr.f32.mxu1 %v2142_v18 }
 0x22b   :  { %728 = vmatmul.mubr.f32.gmra.mrb[4].mxu1 %v573_v26  ;;  %v613_v26 = vpop.permute.xlu1 %612 }
 0x22c   :  { %733 = vmatprep.mubr.f32.mxu1 %v2142_v18 }
 0x22f   :  { %734 = vmatmul.mubr.f32.gmra.mrb[6].mxu1 %v574_v28 }
 0x230   :  { %739 = vmatprep.mubr.f32.mxu1 %v2142_v18 }
 0x233   :  { %740 = vmatmul.mubr.f32.gmra.mrb[8].mxu1 %v575_v29  ;;  %v2474_v29 = vld [vmem:[%s2645_s1 + $0x38] sm:$0xff] }
 0x234   :  { %745 = vmatprep.mubr.f32.mxu1 %v2142_v18  ;;  %890 = vperm.xlu1 %1738, %v2474_v29  }
 0x237   :  { %746 = vmatmul.mubr.f32.gmra.mrb[10].mxu1 %v576_v12  ;;  %v2480_v12 = vld [vmem:[%s2645_s1 + $0x50] sm:$0xff] }
 0x238   :  { %751 = vmatprep.mubr.f32.mxu1 %v2142_v18  ;;  %902 = vperm.xlu0 %1739, %v2480_v12  }
 0x23b   :  { %752 = vmatmul.mubr.f32.gmra.mrb[12].mxu1 %v577_v31 }
 0x23c   :  { %757 = vmatprep.mubr.f32.mxu1 %v2142_v18 }
 0x23f   :  { %758 = vmatmul.mubr.f32.gmra.mrb[14].mxu1 %v578_v16 }
 0x240   :  { %763 = vmatprep.mubr.f32.mxu1 %v2142_v18 }
 0x243   :  { %764 = vmatmul.mubr.f32.gmra.mrb[16].mxu1 %v579_v33 }
 0x244   :  { %769 = vmatprep.mubr.f32.mxu1 %v2142_v18 }
 0x247   :  { %770 = vmatmul.mubr.f32.gmra.mrb[18].mxu1 %v580_v34 }
 0x248   :  { %775 = vmatprep.mubr.f32.mxu1 %v2142_v18 }
 0x24b   :  { %776 = vmatmul.mubr.f32.gmra.mrb[20].mxu1 %v581_v35 }
 0x24c   :  { %781 = vmatprep.mubr.f32.mxu1 %v2142_v18 }
 0x24f   :  { %782 = vmatmul.mubr.f32.gmra.mrb[22].mxu1 %v582_v36 }
 0x250   :  { %787 = vmatprep.mubr.f32.mxu1 %v2142_v18 }
 0x253   :  { %788 = vmatmul.mubr.f32.gmra.mrb[24].mxu1 %v583_v37 }
 0x254   :  { %793 = vmatprep.mubr.f32.mxu1 %v2142_v18 }
 0x257   :  { %794 = vmatmul.mubr.f32.gmra.mrb[26].mxu1 %v584_v38  ;;  %v617_v38 = vpop.permute.xlu0 %616 }
 0x258   :  { %799 = vmatprep.mubr.f32.mxu1 %v2142_v18 }
 0x25b   :  { %800 = vmatmul.mubr.f32.gmra.mrb[28].mxu1 %v585_v39 }
 0x25c   :  { %805 = vmatprep.mubr.f32.mxu1 %v2142_v18 }
 0x25f   :  { %806 = vmatmul.mubr.f32.gmra.mrb[30].mxu1 %v586_v40  ;;  %v2486_v40 = vld [vmem:[%s2645_s1 + $0x48] sm:$0xff] }
 0x260   :  { %1263 = vmatprep.mubr.f32.mxu1 %v2142_v18  ;;  %898 = vperm.xlu1 %1738, %v2486_v40  }
 0x2f6   :  { %v717_v17 = vpop.f32.mrb[0].mxu1 }
 0x2f7   :  { %v718_v14 = vadd.f32 %v717_v17, %v589_v30  ;;  %v719_v2 = vpop.f32.mrb[1].mxu1 }
 0x2f8   :  { %v720_v32 = vadd.f32 %v719_v2, %v589_v30  ;;  %v2492_v30 = vld [vmem:[%s2645_s1 + $0x60] sm:$0xff] }
 0x2f9   :  { %1881 = vtanh.f32 %v718_v14  ;;  %910 = vperm.xlu0 %1739, %v2492_v30  }
 0x2fa   :  { %v723_v4 = vpop.f32.mrb[2].mxu1  ;;  %1883 = vtanh.f32 %v720_v32 }
 0x2fb   :  { %v724_v42 = vadd.f32 %v723_v4, %v593_v41  ;;  %v725_v27 = vpop.f32.mrb[3].mxu1  ;;  %v621_v4 = vpop.permute.xlu1 %620 }
 0x2fc   :  { %v726_v44 = vadd.f32 %v725_v27, %v593_v41  ;;  %v2498_v27 = vld [vmem:[%s2645_s1 + $0x58] sm:$0xff] }
 0x2fd   :  { %1885 = vtanh.f32 %v724_v42  ;;  %906 = vperm.xlu1 %1738, %v2498_v27  }
 0x2fe   :  { %1887 = vtanh.f32 %v726_v44  ;;  %v729_v46 = vpop.f32.mrb[4].mxu1 }
 0x2ff   :  { %v730_v47 = vadd.f32 %v729_v46, %v597_v43  ;;  %v731_v48 = vpop.f32.mrb[5].mxu1 }
 0x300   :  { %v732_v49 = vadd.f32 %v731_v48, %v597_v43  ;;  %v2504_v43 = vld [vmem:[%s2645_s1 + $0x70] sm:$0xff] }
 0x301   :  { %1889 = vtanh.f32 %v730_v47  ;;  %918 = vperm.xlu0 %1739, %v2504_v43  }
 0x302   :  { %v735_v50 = vpop.f32.mrb[6].mxu1  ;;  %1891 = vtanh.f32 %v732_v49 }
 0x303   :  { %v736_v52 = vadd.f32 %v735_v50, %v601_v9  ;;  %v737_v24 = vpop.f32.mrb[7].mxu1  ;;  %v1882_v54 = vpop.eup %1881 }
 0x304   :  { %v738_v53 = vadd.f32 %v737_v24, %v601_v9  ;;  %v1884_v55 = vpop.eup %1883  ;;  %v625_v50 = vpop.permute.xlu0 %624  ;;  %v2510_v24 = vld [vmem:[%s2645_s1 + $0x68] sm:$0xff] }
 0x305   :  { %1893 = vtanh.f32 %v736_v52  ;;  %914 = vperm.xlu1 %1738, %v2510_v24  }
 0x306   :  { %1895 = vtanh.f32 %v738_v53  ;;  %v741_v57 = vpop.f32.mrb[8].mxu1 }
 0x307   :  { %v1886_v58 = vpop.eup %1885  ;;  %v742_v59 = vadd.f32 %v741_v57, %v605_v56  ;;  %v743_v60 = vpop.f32.mrb[9].mxu1 }
 0x308   :  { %v1888_v10 = vpop.eup %1887  ;;  %v744_v61 = vadd.f32 %v743_v60, %v605_v56  ;;  %v1640_v13 = vpack.c.bf16 %v1886_v58, %v1882_v54  ;;  %v629_v58 = vpop.permute.xlu1 %628  ;;  %v2516_v60 = vld [vmem:[%s2645_s1 + $0x78] sm:$0xff]  ;;  %s2150_s1 = smov [#allocation5]  }
 0x309   :  { %v1638_v62 = vpack.c.bf16 %v1888_v10, %v1884_v55  ;;  %1897 = vtanh.f32 %v742_v59  ;;  %922 = vperm.xlu1 %1738, %v2516_v60   ;;  %s1565_s6 = sshll.u32 %s2150_s1, 4  ;;  %s1566_s6 = int_to_ptr.vmem [resolvable:$true] %s1565_s6 }
 0x30a   :  { %v747_v0 = vpop.f32.mrb[10].mxu1  ;;  %1899 = vtanh.f32 %v744_v61  ;;  %s2111_s7 = scalar_lea.vmem %s1566_s6, 32  ;;  %p2116_p9 = scmp.lt.s32.totalorder %s1566_s6, %s1566_s6 }
 0x30b   :  { %v748_v21 = vadd.f32 %v747_v0, %v609_v63  ;;  %v749_v23 = vpop.f32.mrb[11].mxu1  ;;  %1639 = vmatprep.subr.bf16.mxu0 %v1638_v62  ;;  %v1890_v15 = vpop.eup %1889  ;;  %p2112_p8 = scmp.ne.s32.totalorder %s1566_s6, %s2111_s7  ;;  %p2117_p10 = scmp.lt.s32.totalorder %s2111_s7, %s2111_s7 }
 0x30c   :  { %v750_v25 = vadd.f32 %v749_v23, %v609_v63  ;;  %1641 = vmatpush1.bf16.msra.mxu0 %v1640_v13  ;;  %v1892_v5 = vpop.eup %1891  ;;  %v633_v23 = vpop.permute.xlu0 %632 }
 0x30d   :  { %1901 = vtanh.f32 %v748_v21  ;;  %p2118_p11 = por %p2117_p10, %p2116_p9 }
 0x30e   :  { %1903 = vtanh.f32 %v750_v25  ;;  %v753_v28 = vpop.f32.mrb[12].mxu1 }
 0x30f   :  { %v1894_v31 = vpop.eup %1893  ;;  %v754_v16 = vadd.f32 %v753_v28, %v613_v26  ;;  %v755_v33 = vpop.f32.mrb[13].mxu1  ;;  %p2119_p12 = pnand %p2118_p11, %p2112_p8 }
 0x310   :  { %v1896_v34 = vpop.eup %1895  ;;  %v756_v35 = vadd.f32 %v755_v33, %v613_v26  ;;  %v1644_v36 = vpack.c.bf16 %v1894_v31, %v1890_v15 }
 0x311   :  { %v1642_v37 = vpack.c.bf16 %v1896_v34, %v1892_v5  ;;  %1905 = vtanh.f32 %v754_v16  ;;  %v637_v16 = vpop.permute.xlu1 %636 }
 0x312   :  { %v759_v39 = vpop.f32.mrb[14].mxu1  ;;  %1907 = vtanh.f32 %v756_v35 }
 0x313   :  { %v760_v41 = vadd.f32 %v759_v39, %v617_v38  ;;  %v761_v17 = vpop.f32.mrb[15].mxu1  ;;  %1643 = vmatprep.subr.bf16.mxu0 %v1642_v37  ;;  %v1898_v2 = vpop.eup %1897 }
 0x314   :  { %v762_v14 = vadd.f32 %v761_v17, %v617_v38  ;;  %1645 = vmatpush1.bf16.msra.mxu0 %v1644_v36  ;;  %v1900_v32 = vpop.eup %1899  ;;  %v641_v17 = vpop.permute.xlu0 %640 }
 0x315   :  { %1909 = vtanh.f32 %v760_v41 }
 0x316   :  { %1911 = vtanh.f32 %v762_v14  ;;  %v765_v42 = vpop.f32.mrb[16].mxu1 }
 0x317   :  { %v1902_v44 = vpop.eup %1901  ;;  %v766_v45 = vadd.f32 %v765_v42, %v621_v4  ;;  %v767_v46 = vpop.f32.mrb[17].mxu1 }
 0x318   :  { %v1904_v47 = vpop.eup %1903  ;;  %v768_v48 = vadd.f32 %v767_v46, %v621_v4  ;;  %v1648_v49 = vpack.c.bf16 %v1902_v44, %v1898_v2 }
 0x319   :  { %v1646_v9 = vpack.c.bf16 %v1904_v47, %v1900_v32  ;;  %1913 = vtanh.f32 %v766_v45  ;;  %v645_v45 = vpop.permute.xlu1 %644 }
 0x31a   :  { %v771_v52 = vpop.f32.mrb[18].mxu1  ;;  %1915 = vtanh.f32 %v768_v48 }
 0x31b   :  { %v772_v53 = vadd.f32 %v771_v52, %v625_v50  ;;  %v773_v54 = vpop.f32.mrb[19].mxu1  ;;  %1647 = vmatprep.subr.bf16.mxu0 %v1646_v9  ;;  %v1906_v56 = vpop.eup %1905 }
 0x31c   :  { %v774_v55 = vadd.f32 %v773_v54, %v625_v50  ;;  %1649 = vmatpush1.bf16.msra.mxu0 %v1648_v49  ;;  %v1908_v57 = vpop.eup %1907  ;;  %v649_v54 = vpop.permute.xlu0 %648 }
 0x31d   :  { %1917 = vtanh.f32 %v772_v53 }
 0x31e   :  { %1919 = vtanh.f32 %v774_v55  ;;  %v777_v59 = vpop.f32.mrb[20].mxu1 }
 0x31f   :  { %v1910_v10 = vpop.eup %1909  ;;  %v778_v61 = vadd.f32 %v777_v59, %v629_v58  ;;  %v779_v13 = vpop.f32.mrb[21].mxu1 }
 0x320   :  { %v1912_v62 = vpop.eup %1911  ;;  %v780_v63 = vadd.f32 %v779_v13, %v629_v58  ;;  %v1652_v0 = vpack.c.bf16 %v1910_v10, %v1906_v56 }
 0x321   :  { %v1650_v21 = vpack.c.bf16 %v1912_v62, %v1908_v57  ;;  %1921 = vtanh.f32 %v778_v61 }
 0x322   :  { %v783_v25 = vpop.f32.mrb[22].mxu1  ;;  %1923 = vtanh.f32 %v780_v63 }
 0x323   :  { %v784_v15 = vadd.f32 %v783_v25, %v633_v23  ;;  %v785_v5 = vpop.f32.mrb[23].mxu1  ;;  %1651 = vmatprep.subr.bf16.mxu0 %v1650_v21  ;;  %v1914_v28 = vpop.eup %1913 }
 0x324   :  { %v786_v26 = vadd.f32 %v785_v5, %v633_v23  ;;  %1653 = vmatpush1.bf16.msra.mxu0 %v1652_v0  ;;  %v1916_v31 = vpop.eup %1915 }
 0x325   :  { %1925 = vtanh.f32 %v784_v15 }
 0x326   :  { %1927 = vtanh.f32 %v786_v26  ;;  %v789_v33 = vpop.f32.mrb[24].mxu1  ;;  %v845_v26 = vld [vmem:[#allocation2 + $0x100] sm:$0xff] }
 0x327   :  { %v1918_v34 = vpop.eup %1917  ;;  %v790_v35 = vadd.f32 %v789_v33, %v637_v16  ;;  %v791_v36 = vpop.f32.mrb[25].mxu1  ;;  %v849_v33 = vld [vmem:[#allocation2 + $0x120] sm:$0xff] }
 0x328   :  { %v1920_v37 = vpop.eup %1919  ;;  %v792_v38 = vadd.f32 %v791_v36, %v637_v16  ;;  %v1656_v39 = vpack.c.bf16 %v1918_v34, %v1914_v28  ;;  %v846_v28 = vld [vmem:[#allocation2 + $0x108] sm:$0xff]  ;;  %v848_v16 = vld [vmem:[#allocation2 + $0x118] sm:$0xff] }
 0x329   :  { %v1654_v41 = vpack.c.bf16 %v1920_v37, %v1916_v31  ;;  %1929 = vtanh.f32 %v790_v35  ;;  %v847_v31 = vld [vmem:[#allocation2 + $0x110] sm:$0xff]  ;;  %v850_v34 = vld [vmem:[#allocation2 + $0x128] sm:$0xff]  ;;  %v852_v36 = vld [vmem:[#allocation2 + $0x138] sm:$0xff] }
 0x32a   :  { %v795_v14 = vpop.f32.mrb[26].mxu1  ;;  %1931 = vtanh.f32 %v792_v38  ;;  %v851_v35 = vld [vmem:[#allocation2 + $0x130] sm:$0xff]  ;;  %v853_v37 = vld [vmem:[#allocation2 + $0x140] sm:$0xff]  ;;  %v854_v38 = vld [vmem:[#allocation2 + $0x148] sm:$0xff] }
 0x32b   :  { %v796_v2 = vadd.f32 %v795_v14, %v641_v17  ;;  %v797_v32 = vpop.f32.mrb[27].mxu1  ;;  %1655 = vmatprep.subr.bf16.mxu0 %v1654_v41  ;;  %v1922_v42 = vpop.eup %1921  ;;  %v856_v41 = vld [vmem:[#allocation2 + $0x158] sm:$0xff]  ;;  %v858_v14 = vld [vmem:[#allocation2 + $0x168] sm:$0xff] }
 0x32c   :  { %v798_v4 = vadd.f32 %v797_v32, %v641_v17  ;;  %1657 = vmatpush1.bf16.msra.mxu0 %v1656_v39  ;;  %v1924_v44 = vpop.eup %1923  ;;  %v855_v39 = vld [vmem:[#allocation2 + $0x150] sm:$0xff]  ;;  %v857_v17 = vld [vmem:[#allocation2 + $0x160] sm:$0xff]  ;;  %v860_v32 = vld [vmem:[#allocation2 + $0x178] sm:$0xff] }
 0x32d   :  { %1933 = vtanh.f32 %v796_v2  ;;  %v859_v2 = vld [vmem:[#allocation2 + $0x170] sm:$0xff] }
 0x32e   :  { %1935 = vtanh.f32 %v798_v4  ;;  %v801_v46 = vpop.f32.mrb[28].mxu1  ;;  %v863_v4 = vpop.permute.xlu1 %862 }
 0x32f   :  { %v1926_v47 = vpop.eup %1925  ;;  %v802_v48 = vadd.f32 %v801_v46, %v645_v45  ;;  %v803_v49 = vpop.f32.mrb[29].mxu1 }
 0x330   :  { %v1928_v9 = vpop.eup %1927  ;;  %v804_v50 = vadd.f32 %v803_v49, %v645_v45  ;;  %v1660_v52 = vpack.c.bf16 %v1926_v47, %v1922_v42  ;;  %v867_v46 = vpop.permute.xlu0 %866 }
 0x331   :  { %v1658_v53 = vpack.c.bf16 %v1928_v9, %v1924_v44  ;;  %1937 = vtanh.f32 %v802_v48 }
 0x332   :  { %v807_v55 = vpop.f32.mrb[30].mxu1  ;;  %1939 = vtanh.f32 %v804_v50  ;;  %v871_v50 = vpop.permute.xlu1 %870 }
 0x333   :  { %v808_v56 = vadd.f32 %v807_v55, %v649_v54  ;;  %v809_v57 = vpop.f32.mrb[31].mxu1  ;;  %1659 = vmatprep.subr.bf16.mxu0 %v1658_v53  ;;  %v1930_v59 = vpop.eup %1929 }
 0x334   :  { %v810_v58 = vadd.f32 %v809_v57, %v649_v54  ;;  %1661 = vmatpush1.bf16.msra.mxu0 %v1660_v52  ;;  %v1932_v10 = vpop.eup %1931 }
 0x335   :  { %1941 = vtanh.f32 %v808_v56  ;;  %v2146_v56 = vmov 4  }
 0x336   :  { %1943 = vtanh.f32 %v810_v58  ;;  %1741 = vset.pattern.permute.xlu1 %v2146_v56  ;;  %1740 = vset.pattern.permute.xlu0 %v2146_v56  ;;  %v875_v58 = vpop.permute.xlu1 %874 }
 0x337   :  { %v1934_v61 = vpop.eup %1933  ;;  %1140 = vperm.xlu1 %1741, %v2432_v1   ;;  %1136 = vperm.xlu0 %1740, %v2426_v6  }
 0x338   :  { %v1936_v13 = vpop.eup %1935  ;;  %v1664_v62 = vpack.c.bf16 %v1934_v61, %v1930_v59 }
 0x339   :  { %v1662_v63 = vpack.c.bf16 %v1936_v13, %v1932_v10 }
 0x33b   :  { %1663 = vmatprep.subr.bf16.mxu0 %v1662_v63  ;;  %v1938_v0 = vpop.eup %1937  ;;  %1144 = vperm.xlu1 %1741, %v2438_v8  }
 0x33c   :  { %1665 = vmatpush1.bf16.msra.mxu0 %v1664_v62  ;;  %v1940_v21 = vpop.eup %1939  ;;  %1148 = vperm.xlu0 %1740, %v2450_v11  }
 0x33f   :  { %v1942_v23 = vpop.eup %1941  ;;  %1152 = vperm.xlu1 %1741, %v2444_v51  }
 0x340   :  { %v1944_v25 = vpop.eup %1943  ;;  %v1668_v15 = vpack.c.bf16 %v1942_v23, %v1938_v0  ;;  %v879_v0 = vpop.permute.xlu0 %878  ;;  %1156 = vperm.xlu0 %1740, %v2462_v7  }
 0x341   :  { %v1666_v5 = vpack.c.bf16 %v1944_v25, %v1940_v21 }
 0x343   :  { %1667 = vmatprep.subr.bf16.mxu0 %v1666_v5  ;;  %1160 = vperm.xlu1 %1741, %v2456_v3  }
 0x344   :  { %1669 = vmatpush1.bf16.msra.mxu0 %v1668_v15  ;;  %1164 = vperm.xlu0 %1740, %v2474_v29  }
 0x347   :  { %990 = vmatmul.mubr.f32.vlgmr.msra.gmra.mrb[32].mxu0 %v845_v26 }
 0x348   :  { %995 = vmatprep.mubr.f32.mxu0 %v2142_v18  ;;  %1172 = vperm.xlu0 %1740, %v2486_v40  }
 0x34b   :  { %996 = vmatmul.mubr.f32.gmra.mrb[34].mxu0 %v846_v28 }
 0x34c   :  { %1001 = vmatprep.mubr.f32.mxu0 %v2142_v18 }
 0x34f   :  { %1002 = vmatmul.mubr.f32.gmra.mrb[36].mxu0 %v847_v31 }
 0x350   :  { %1007 = vmatprep.mubr.f32.mxu0 %v2142_v18 }
 0x353   :  { %1008 = vmatmul.mubr.f32.gmra.mrb[38].mxu0 %v848_v16  ;;  %v883_v16 = vpop.permute.xlu1 %882 }
 0x354   :  { %1013 = vmatprep.mubr.f32.mxu0 %v2142_v18 }
 0x357   :  { %1014 = vmatmul.mubr.f32.gmra.mrb[40].mxu0 %v849_v33 }
 0x358   :  { %1019 = vmatprep.mubr.f32.mxu0 %v2142_v18 }
 0x35b   :  { %1020 = vmatmul.mubr.f32.gmra.mrb[42].mxu0 %v850_v34 }
 0x35c   :  { %1025 = vmatprep.mubr.f32.mxu0 %v2142_v18 }
 0x35f   :  { %1026 = vmatmul.mubr.f32.gmra.mrb[44].mxu0 %v851_v35 }
 0x360   :  { %1031 = vmatprep.mubr.f32.mxu0 %v2142_v18 }
 0x363   :  { %1032 = vmatmul.mubr.f32.gmra.mrb[46].mxu0 %v852_v36 }
 0x364   :  { %1037 = vmatprep.mubr.f32.mxu0 %v2142_v18 }
 0x367   :  { %1038 = vmatmul.mubr.f32.gmra.mrb[48].mxu0 %v853_v37 }
 0x368   :  { %1043 = vmatprep.mubr.f32.mxu0 %v2142_v18 }
 0x36b   :  { %1044 = vmatmul.mubr.f32.gmra.mrb[50].mxu0 %v854_v38 }
 0x36c   :  { %1049 = vmatprep.mubr.f32.mxu0 %v2142_v18 }
 0x36f   :  { %1050 = vmatmul.mubr.f32.gmra.mrb[52].mxu0 %v855_v39  ;;  %v887_v39 = vpop.permute.xlu0 %886 }
 0x370   :  { %1055 = vmatprep.mubr.f32.mxu0 %v2142_v18 }
 0x373   :  { %1056 = vmatmul.mubr.f32.gmra.mrb[54].mxu0 %v856_v41 }
 0x374   :  { %1061 = vmatprep.mubr.f32.mxu0 %v2142_v18 }
 0x377   :  { %1062 = vmatmul.mubr.f32.gmra.mrb[56].mxu0 %v857_v17 }
 0x378   :  { %1067 = vmatprep.mubr.f32.mxu0 %v2142_v18 }
 0x37b   :  { %1068 = vmatmul.mubr.f32.gmra.mrb[58].mxu0 %v858_v14 }
 0x37c   :  { %1073 = vmatprep.mubr.f32.mxu0 %v2142_v18 }
 0x37f   :  { %1074 = vmatmul.mubr.f32.gmra.mrb[60].mxu0 %v859_v2 }
 0x380   :  { %1079 = vmatprep.mubr.f32.mxu0 %v2142_v18 }
 0x383   :  { %1080 = vmatmul.mubr.f32.gmra.mrb[62].mxu0 %v860_v32 }
 0x41a   :  { %v991_v42 = vpop.f32.mrb[32].mxu0 }
 0x41b   :  { %v992_v44 = vadd.f32 %v991_v42, %v863_v4  ;;  %v993_v45 = vpop.f32.mrb[33].mxu0 }
 0x41c   :  { %v994_v47 = vadd.f32 %v993_v45, %v863_v4 }
 0x41d   :  { %1945 = vtanh.f32 %v992_v44  ;;  %v2147_v44 = vmov 6  }
 0x41e   :  { %v997_v48 = vpop.f32.mrb[34].mxu0  ;;  %1947 = vtanh.f32 %v994_v47  ;;  %1742 = vset.pattern.permute.xlu1 %v2147_v44  ;;  %1745 = vset.pattern.permute.xlu0 %v2147_v44 }
 0x41f   :  { %v998_v49 = vadd.f32 %v997_v48, %v867_v46  ;;  %v999_v9 = vpop.f32.mrb[35].mxu0  ;;  %1393 = vperm.xlu1 %1742, %v2426_v6   ;;  %1397 = vperm.xlu0 %1745, %v2432_v1  }
 0x420   :  { %v1000_v52 = vadd.f32 %v999_v9, %v867_v46  ;;  %v891_v46 = vpop.permute.xlu1 %890 }
 0x421   :  { %1949 = vtanh.f32 %v998_v49 }
 0x422   :  { %1951 = vtanh.f32 %v1000_v52  ;;  %v1003_v53 = vpop.f32.mrb[36].mxu0 }
 0x423   :  { %v1004_v54 = vadd.f32 %v1003_v53, %v871_v50  ;;  %v1005_v55 = vpop.f32.mrb[37].mxu0  ;;  %1743 = vset.pattern.permute.xlu1 %v2146_v56  ;;  %v895_v53 = vpop.permute.xlu0 %894  ;;  %1409 = vperm.xlu0 %1745, %v2444_v51  }
 0x424   :  { %v1006_v57 = vadd.f32 %v1005_v55, %v871_v50  ;;  %1168 = vperm.xlu1 %1743, %v2468_v20  }
 0x425   :  { %1953 = vtanh.f32 %v1004_v54 }
 0x426   :  { %v1009_v59 = vpop.f32.mrb[38].mxu0  ;;  %1955 = vtanh.f32 %v1006_v57 }
 0x427   :  { %v1010_v10 = vadd.f32 %v1009_v59, %v875_v58  ;;  %v1011_v61 = vpop.f32.mrb[39].mxu0  ;;  %v1946_v62 = vpop.eup %1945  ;;  %1421 = vperm.xlu0 %1745, %v2474_v29  }
 0x428   :  { %v1012_v13 = vadd.f32 %v1011_v61, %v875_v58  ;;  %v1948_v63 = vpop.eup %1947  ;;  %1744 = vset.pattern.permute.xlu1 %v2147_v44 }
 0x429   :  { %1957 = vtanh.f32 %v1010_v10  ;;  %1401 = vperm.xlu1 %1744, %v2438_v8  }
 0x42a   :  { %1959 = vtanh.f32 %v1012_v13  ;;  %v1015_v21 = vpop.f32.mrb[40].mxu0 }
 0x42b   :  { %v1950_v23 = vpop.eup %1949  ;;  %v1016_v25 = vadd.f32 %v1015_v21, %v879_v0  ;;  %v1017_v15 = vpop.f32.mrb[41].mxu0  ;;  %1749 = vset.pattern.permute.xlu0 %v2146_v56 }
 0x42c   :  { %v1952_v5 = vpop.eup %1951  ;;  %v1018_v26 = vadd.f32 %v1017_v15, %v879_v0  ;;  %v1672_v28 = vpack.c.bf16 %v1950_v23, %v1946_v62  ;;  %v899_v62 = vpop.permute.xlu1 %898  ;;  %1184 = vperm.xlu0 %1749, %v2492_v30  }
 0x42d   :  { %v1670_v31 = vpack.c.bf16 %v1952_v5, %v1948_v63  ;;  %1961 = vtanh.f32 %v1016_v25  ;;  %v903_v15 = vpop.permute.xlu0 %902  ;;  %1405 = vperm.xlu1 %1744, %v2450_v11  }
 0x42e   :  { %v1021_v33 = vpop.f32.mrb[42].mxu0  ;;  %1963 = vtanh.f32 %v1018_v26 }
 0x42f   :  { %v1022_v34 = vadd.f32 %v1021_v33, %v883_v16  ;;  %v1023_v35 = vpop.f32.mrb[43].mxu0  ;;  %1671 = vmatprep.subr.bf16.mxu1 %v1670_v31  ;;  %v1954_v37 = vpop.eup %1953 }
 0x430   :  { %v1024_v36 = vadd.f32 %v1023_v35, %v883_v16  ;;  %1673 = vmatpush1.bf16.msra.mxu1 %v1672_v28  ;;  %v1956_v38 = vpop.eup %1955  ;;  %1196 = vperm.xlu0 %1749, %v2516_v60  }
 0x431   :  { %1965 = vtanh.f32 %v1022_v34  ;;  %v907_v34 = vpop.permute.xlu1 %906  ;;  %1746 = vset.pattern.permute.xlu1 %v2146_v56 }
 0x432   :  { %1967 = vtanh.f32 %v1024_v36  ;;  %v1027_v41 = vpop.f32.mrb[44].mxu0  ;;  %1176 = vperm.xlu1 %1746, %v2480_v12  }
 0x433   :  { %v1958_v17 = vpop.eup %1957  ;;  %v1028_v14 = vadd.f32 %v1027_v41, %v887_v39  ;;  %v1029_v2 = vpop.f32.mrb[45].mxu0 }
 0x434   :  { %v1960_v32 = vpop.eup %1959  ;;  %v1030_v4 = vadd.f32 %v1029_v2, %v887_v39  ;;  %v1676_v42 = vpack.c.bf16 %v1958_v17, %v1954_v37  ;;  %v911_v39 = vpop.permute.xlu0 %910  ;;  %1751 = vset.pattern.permute.xlu0 %v2147_v44 }
 0x435   :  { %v1674_v45 = vpack.c.bf16 %v1960_v32, %v1956_v38  ;;  %1969 = vtanh.f32 %v1028_v14  ;;  %1437 = vperm.xlu0 %1751, %v2498_v27  }
 0x436   :  { %v1033_v47 = vpop.f32.mrb[46].mxu0  ;;  %1971 = vtanh.f32 %v1030_v4  ;;  %1180 = vperm.xlu1 %1746, %v2498_v27  }
 0x437   :  { %v1034_v48 = vadd.f32 %v1033_v47, %v891_v46  ;;  %v1035_v49 = vpop.f32.mrb[47].mxu0  ;;  %1675 = vmatprep.subr.bf16.mxu1 %v1674_v45  ;;  %v1962_v50 = vpop.eup %1961 }
 0x438   :  { %v1036_v9 = vadd.f32 %v1035_v49, %v891_v46  ;;  %1677 = vmatpush1.bf16.msra.mxu1 %v1676_v42  ;;  %v1964_v52 = vpop.eup %1963  ;;  %v915_v46 = vpop.permute.xlu1 %914 }
 0x439   :  { %1973 = vtanh.f32 %v1034_v48  ;;  %1449 = vperm.xlu0 %1751, %v2504_v43  }
 0x43a   :  { %1975 = vtanh.f32 %v1036_v9  ;;  %v1039_v54 = vpop.f32.mrb[48].mxu0  ;;  %1747 = vset.pattern.permute.xlu1 %v2147_v44 }
 0x43b   :  { %v1966_v55 = vpop.eup %1965  ;;  %v1040_v57 = vadd.f32 %v1039_v54, %v895_v53  ;;  %v1041_v58 = vpop.f32.mrb[49].mxu0  ;;  %1413 = vperm.xlu1 %1747, %v2462_v7  }
 0x43c   :  { %v1968_v59 = vpop.eup %1967  ;;  %v1042_v10 = vadd.f32 %v1041_v58, %v895_v53  ;;  %v1680_v61 = vpack.c.bf16 %v1966_v55, %v1962_v50  ;;  %v919_v53 = vpop.permute.xlu0 %918 }
 0x43d   :  { %v1678_v13 = vpack.c.bf16 %v1968_v59, %v1964_v52  ;;  %1977 = vtanh.f32 %v1040_v57 }
 0x43e   :  { %v1045_v63 = vpop.f32.mrb[50].mxu0  ;;  %1979 = vtanh.f32 %v1042_v10 }
 0x43f   :  { %v1046_v0 = vadd.f32 %v1045_v63, %v899_v62  ;;  %v1047_v21 = vpop.f32.mrb[51].mxu0  ;;  %1679 = vmatprep.subr.bf16.mxu1 %v1678_v13  ;;  %v1970_v23 = vpop.eup %1969  ;;  %1417 = vperm.xlu1 %1747, %v2456_v3   ;;  %v2148_v3 = vmov 7  }
 0x440   :  { %v1048_v1 = vadd.f32 %v1047_v21, %v899_v62  ;;  %1681 = vmatpush1.bf16.msra.mxu1 %v1680_v61  ;;  %v1972_v25 = vpop.eup %1971  ;;  %v923_v62 = vpop.permute.xlu1 %922  ;;  %1752 = vset.pattern.permute.xlu0 %v2148_v3 }
 0x441   :  { %1981 = vtanh.f32 %v1046_v0  ;;  %1531 = vperm.xlu0 %1752, %v2426_v6   ;;  %v1119_v6 = vld [vmem:[#allocation2 + $0x180] sm:$0xff] }
 0x442   :  { %1983 = vtanh.f32 %v1048_v1  ;;  %v1051_v5 = vpop.f32.mrb[52].mxu0 }
 0x443   :  { %v1974_v26 = vpop.eup %1973  ;;  %v1052_v28 = vadd.f32 %v1051_v5, %v903_v15  ;;  %v1053_v51 = vpop.f32.mrb[53].mxu0  ;;  %1748 = vset.pattern.permute.xlu1 %v2146_v56 }
 0x444   :  { %v1976_v31 = vpop.eup %1975  ;;  %v1054_v16 = vadd.f32 %v1053_v51, %v903_v15  ;;  %v1684_v33 = vpack.c.bf16 %v1974_v26, %v1970_v23  ;;  %1188 = vperm.xlu1 %1748, %v2510_v24  }
 0x445   :  { %v1682_v8 = vpack.c.bf16 %v1976_v31, %v1972_v25  ;;  %1985 = vtanh.f32 %v1052_v28 }
 0x446   :  { %v1057_v35 = vpop.f32.mrb[54].mxu0  ;;  %1987 = vtanh.f32 %v1054_v16 }
 0x447   :  { %v1058_v36 = vadd.f32 %v1057_v35, %v907_v34  ;;  %v1059_v37 = vpop.f32.mrb[55].mxu0  ;;  %1683 = vmatprep.subr.bf16.mxu1 %v1682_v8  ;;  %v1978_v11 = vpop.eup %1977  ;;  %v1129_v8 = vld [vmem:[#allocation2 + $0x1d0] sm:$0xff]  ;;  %v1131_v35 = vld [vmem:[#allocation2 + $0x1e0] sm:$0xff] }
 0x448   :  { %v1060_v29 = vadd.f32 %v1059_v37, %v907_v34  ;;  %1685 = vmatpush1.bf16.msra.mxu1 %v1684_v33  ;;  %v1980_v38 = vpop.eup %1979  ;;  %1192 = vperm.xlu1 %1748, %v2504_v43   ;;  %v1120_v43 = vld [vmem:[#allocation2 + $0x188] sm:$0xff]  ;;  %v1127_v33 = vld [vmem:[#allocation2 + $0x1c0] sm:$0xff]  ;;  %v1130_v34 = vld [vmem:[#allocation2 + $0x1d8] sm:$0xff] }
 0x449   :  { %1989 = vtanh.f32 %v1058_v36  ;;  %v1132_v36 = vld [vmem:[#allocation2 + $0x1e8] sm:$0xff]  ;;  %v1133_v37 = vld [vmem:[#allocation2 + $0x1f0] sm:$0xff] }
 0x44a   :  { %1991 = vtanh.f32 %v1060_v29  ;;  %v1063_v41 = vpop.f32.mrb[56].mxu0  ;;  %v1134_v29 = vld [vmem:[#allocation2 + $0x1f8] sm:$0xff] }
 0x44b   :  { %v1982_v17 = vpop.eup %1981  ;;  %v1064_v14 = vadd.f32 %v1063_v41, %v911_v39  ;;  %v1065_v2 = vpop.f32.mrb[57].mxu0 }
 0x44c   :  { %v1984_v32 = vpop.eup %1983  ;;  %v1066_v4 = vadd.f32 %v1065_v2, %v911_v39  ;;  %v1688_v42 = vpack.c.bf16 %v1982_v17, %v1978_v11  ;;  %1750 = vset.pattern.permute.xlu1 %v2147_v44  ;;  %v1124_v44 = vld [vmem:[#allocation2 + $0x1a8] sm:$0xff]  ;;  %v1141_v11 = vpop.permute.xlu1 %1140 }
 0x44d   :  { %v1686_v45 = vpack.c.bf16 %v1984_v32, %v1980_v38  ;;  %1993 = vtanh.f32 %v1064_v14  ;;  %1425 = vperm.xlu1 %1750, %v2468_v20   ;;  %v1121_v20 = vld [vmem:[#allocation2 + $0x190] sm:$0xff]  ;;  %v1137_v14 = vpop.permute.xlu0 %1136 }
 0x44e   :  { %v1069_v47 = vpop.f32.mrb[58].mxu0  ;;  %1995 = vtanh.f32 %v1066_v4 }
 0x44f   :  { %v1070_v48 = vadd.f32 %v1069_v47, %v915_v46  ;;  %v1071_v49 = vpop.f32.mrb[59].mxu0  ;;  %1687 = vmatprep.subr.bf16.mxu1 %v1686_v45  ;;  %v1986_v50 = vpop.eup %1985 }
 0x450   :  { %v1072_v9 = vadd.f32 %v1071_v49, %v915_v46  ;;  %1689 = vmatpush1.bf16.msra.mxu1 %v1688_v42  ;;  %v1988_v52 = vpop.eup %1987  ;;  %v1145_v38 = vpop.permute.xlu1 %1144 }
 0x451   :  { %1997 = vtanh.f32 %v1070_v48  ;;  %1429 = vperm.xlu1 %1750, %v2486_v40   ;;  %v1122_v40 = vld [vmem:[#allocation2 + $0x198] sm:$0xff]  ;;  %v1149_v32 = vpop.permute.xlu0 %1148 }
 0x452   :  { %1999 = vtanh.f32 %v1072_v9  ;;  %v1075_v54 = vpop.f32.mrb[60].mxu0 }
 0x453   :  { %v1990_v55 = vpop.eup %1989  ;;  %v1076_v57 = vadd.f32 %v1075_v54, %v919_v53  ;;  %v1077_v58 = vpop.f32.mrb[61].mxu0 }
 0x454   :  { %v1992_v59 = vpop.eup %1991  ;;  %v1078_v10 = vadd.f32 %v1077_v58, %v919_v53  ;;  %v1692_v61 = vpack.c.bf16 %v1990_v55, %v1986_v50  ;;  %v1153_v39 = vpop.permute.xlu1 %1152 }
 0x455   :  { %v1690_v13 = vpack.c.bf16 %v1992_v59, %v1988_v52  ;;  %2001 = vtanh.f32 %v1076_v57  ;;  %1433 = vperm.xlu1 %1750, %v2480_v12   ;;  %v1123_v12 = vld [vmem:[#allocation2 + $0x1a0] sm:$0xff]  ;;  %v1157_v42 = vpop.permute.xlu0 %1156 }
 0x456   :  { %v1081_v63 = vpop.f32.mrb[62].mxu0  ;;  %2003 = vtanh.f32 %v1078_v10 }
 0x457   :  { %v1082_v7 = vadd.f32 %v1081_v63, %v923_v62  ;;  %v1083_v0 = vpop.f32.mrb[63].mxu0  ;;  %1691 = vmatprep.subr.bf16.mxu1 %v1690_v13  ;;  %v1994_v27 = vpop.eup %1993 }
 0x458   :  { %v1084_v21 = vadd.f32 %v1083_v0, %v923_v62  ;;  %1693 = vmatpush1.bf16.msra.mxu1 %v1692_v61  ;;  %v1996_v1 = vpop.eup %1995  ;;  %v2594_v41 = vpop.permute.xlu1 %1160 }
 0x459   :  { %2005 = vtanh.f32 %v1082_v7  ;;  %1441 = vperm.xlu1 %1750, %v2492_v30   ;;  %v1125_v30 = vld [vmem:[#allocation2 + $0x1b0] sm:$0xff]  ;;  %v2600_v49 = vpop.permute.xlu0 %1164 }
 0x45a   :  { %2007 = vtanh.f32 %v1084_v21 }
 0x45b   :  { %v1998_v23 = vpop.eup %1997 }
 0x45c   :  { %v2000_v25 = vpop.eup %1999  ;;  %v1696_v15 = vpack.c.bf16 %v1998_v23, %v1994_v27 }
 0x45d   :  { %v1694_v5 = vpack.c.bf16 %v2000_v25, %v1996_v1  ;;  %1445 = vperm.xlu1 %1750, %v2510_v24   ;;  %v1126_v24 = vld [vmem:[#allocation2 + $0x1b8] sm:$0xff]  ;;  %v2604_v59 = vpop.permute.xlu0 %1172 }
 0x45f   :  { %1695 = vmatprep.subr.bf16.mxu1 %v1694_v5  ;;  %v2002_v26 = vpop.eup %2001 }
 0x460   :  { %1697 = vmatpush1.bf16.msra.mxu1 %v1696_v15  ;;  %v2004_v28 = vpop.eup %2003 }
 0x461   :  { %1453 = vperm.xlu1 %1750, %v2516_v60   ;;  %v1128_v60 = vld [vmem:[#allocation2 + $0x1c8] sm:$0xff] }
 0x463   :  { %v2006_v56 = vpop.eup %2005 }
 0x464   :  { %v2008_v51 = vpop.eup %2007  ;;  %v1700_v31 = vpack.c.bf16 %v2006_v56, %v2002_v26 }
 0x465   :  { %v1698_v16 = vpack.c.bf16 %v2008_v51, %v2004_v28 }
 0x467   :  { %1699 = vmatprep.subr.bf16.mxu1 %v1698_v16 }
 0x468   :  { %1701 = vmatpush1.bf16.msra.mxu1 %v1700_v31 }
 0x46b   :  { %1264 = vmatmul.mubr.f32.vlgmr.msra.gmra.mrb[32].mxu1 %v1119_v6 }
 0x46c   :  { %1269 = vmatprep.mubr.f32.mxu1 %v2142_v18 }
 0x46f   :  { %1270 = vmatmul.mubr.f32.gmra.mrb[34].mxu1 %v1120_v43 }
 0x470   :  { %1275 = vmatprep.mubr.f32.mxu1 %v2142_v18 }
 0x473   :  { %1276 = vmatmul.mubr.f32.gmra.mrb[36].mxu1 %v1121_v20 }
 0x474   :  { %1281 = vmatprep.mubr.f32.mxu1 %v2142_v18 }
 0x477   :  { %1282 = vmatmul.mubr.f32.gmra.mrb[38].mxu1 %v1122_v40 }
 0x478   :  { %1287 = vmatprep.mubr.f32.mxu1 %v2142_v18 }
 0x47b   :  { %1288 = vmatmul.mubr.f32.gmra.mrb[40].mxu1 %v1123_v12 }
 0x47c   :  { %1293 = vmatprep.mubr.f32.mxu1 %v2142_v18 }
 0x47f   :  { %1294 = vmatmul.mubr.f32.gmra.mrb[42].mxu1 %v1124_v44 }
 0x480   :  { %1299 = vmatprep.mubr.f32.mxu1 %v2142_v18 }
 0x483   :  { %1300 = vmatmul.mubr.f32.gmra.mrb[44].mxu1 %v1125_v30 }
 0x484   :  { %1305 = vmatprep.mubr.f32.mxu1 %v2142_v18 }
 0x487   :  { %1306 = vmatmul.mubr.f32.gmra.mrb[46].mxu1 %v1126_v24 }
 0x488   :  { %1311 = vmatprep.mubr.f32.mxu1 %v2142_v18 }
 0x48b   :  { %1312 = vmatmul.mubr.f32.gmra.mrb[48].mxu1 %v1127_v33 }
 0x48c   :  { %1317 = vmatprep.mubr.f32.mxu1 %v2142_v18 }
 0x48f   :  { %1318 = vmatmul.mubr.f32.gmra.mrb[50].mxu1 %v1128_v60 }
 0x490   :  { %1323 = vmatprep.mubr.f32.mxu1 %v2142_v18 }
 0x493   :  { %1324 = vmatmul.mubr.f32.gmra.mrb[52].mxu1 %v1129_v8 }
 0x494   :  { %1329 = vmatprep.mubr.f32.mxu1 %v2142_v18 }
 0x497   :  { %1330 = vmatmul.mubr.f32.gmra.mrb[54].mxu1 %v1130_v34 }
 0x498   :  { %1335 = vmatprep.mubr.f32.mxu1 %v2142_v18 }
 0x49b   :  { %1336 = vmatmul.mubr.f32.gmra.mrb[56].mxu1 %v1131_v35 }
 0x49c   :  { %1341 = vmatprep.mubr.f32.mxu1 %v2142_v18 }
 0x49e   :  { %v1394_v17 = vpop.permute.xlu1 %1393  ;;  %v1398_v21 = vpop.permute.xlu0 %1397 }
 0x49f   :  { %1342 = vmatmul.mubr.f32.gmra.mrb[58].mxu1 %v1132_v36 }
 0x4a0   :  { %1347 = vmatprep.mubr.f32.mxu1 %v2142_v18 }
 0x4a3   :  { %1348 = vmatmul.mubr.f32.gmra.mrb[60].mxu1 %v1133_v37  ;;  %v2596_v2 = vpop.permute.xlu1 %1168 }
 0x4a4   :  { %1353 = vmatprep.mubr.f32.mxu1 %v2142_v18 }
 0x4a7   :  { %1354 = vmatmul.mubr.f32.gmra.mrb[62].mxu1 %v1134_v29 }
 0x4a8   :  { %v1402_v4 = vpop.permute.xlu1 %1401 }
 0x4ac   :  { %v2598_v45 = vpop.permute.xlu1 %1405 }
 0x4b1   :  { %v2602_v53 = vpop.permute.xlu1 %1176 }
 0x4b5   :  { %v2606_v61 = vpop.permute.xlu1 %1180 }
 0x4ba   :  { %v1414_v15 = vpop.permute.xlu1 %1413 }
 0x4be   :  { %v1418_v60 = vpop.permute.xlu1 %1417 }
 0x53e   :  { %v1265_v46 = vpop.f32.mrb[32].mxu1 }
 0x53f   :  { %v1266_v47 = vadd.f32 %v1265_v46, %v1137_v14  ;;  %v1267_v48 = vpop.f32.mrb[33].mxu1 }
 0x540   :  { %v1268_v18 = vadd.f32 %v1267_v48, %v1137_v14 }
 0x541   :  { %2009 = vtanh.f32 %v1266_v47 }
 0x542   :  { %v1271_v9 = vpop.f32.mrb[34].mxu1  ;;  %2011 = vtanh.f32 %v1268_v18  ;;  %v2613_v18 = vpop.permute.xlu1 %1188 }
 0x543   :  { %v1272_v50 = vadd.f32 %v1271_v9, %v1141_v11  ;;  %v1273_v52 = vpop.f32.mrb[35].mxu1 }
 0x544   :  { %v1274_v54 = vadd.f32 %v1273_v52, %v1141_v11 }
 0x545   :  { %2013 = vtanh.f32 %v1272_v50 }
 0x546   :  { %2015 = vtanh.f32 %v1274_v54  ;;  %v1277_v55 = vpop.f32.mrb[36].mxu1 }
 0x547   :  { %v1278_v57 = vadd.f32 %v1277_v55, %v1145_v38  ;;  %v1279_v58 = vpop.f32.mrb[37].mxu1 }
 0x548   :  { %v1280_v10 = vadd.f32 %v1279_v58, %v1145_v38 }
 0x549   :  { %2017 = vtanh.f32 %v1278_v57 }
 0x54a   :  { %2019 = vtanh.f32 %v1280_v10  ;;  %v1283_v13 = vpop.f32.mrb[38].mxu1 }
 0x54b   :  { %v1284_v62 = vadd.f32 %v1283_v13, %v1149_v32  ;;  %v1285_v63 = vpop.f32.mrb[39].mxu1  ;;  %v2010_v0 = vpop.eup %2009 }
 0x54c   :  { %v1286_v7 = vadd.f32 %v1285_v63, %v1149_v32  ;;  %v2012_v27 = vpop.eup %2011  ;;  %v1456_v26 = vmul.f32 %v2010_v0, %v1394_v17  ;;  %v2618_v0 = vpop.permute.xlu1 %1192 }
 0x54d   :  { %2021 = vtanh.f32 %v1284_v62  ;;  %v1457_v51 = vmul.f32 %v2012_v27, %v1394_v17  ;;  %v1410_v17 = vpop.permute.xlu0 %1409 }
 0x54e   :  { %2023 = vtanh.f32 %v1286_v7  ;;  %v1289_v1 = vpop.f32.mrb[40].mxu1 }
 0x54f   :  { %v2014_v3 = vpop.eup %2013  ;;  %v1290_v23 = vadd.f32 %v1289_v1, %v1153_v39  ;;  %v1291_v25 = vpop.f32.mrb[41].mxu1 }
 0x550   :  { %v2016_v5 = vpop.eup %2015  ;;  %v1458_v28 = vmul.f32 %v2014_v3, %v1398_v21  ;;  %v1292_v56 = vadd.f32 %v1291_v25, %v1153_v39 }
 0x551   :  { %2025 = vtanh.f32 %v1290_v23  ;;  %v1459_v31 = vmul.f32 %v2016_v5, %v1398_v21 }
 0x552   :  { %v1488_v16 = vadd.f32 %v1458_v28, %v1456_v26  ;;  %2027 = vtanh.f32 %v1292_v56  ;;  %v1295_v6 = vpop.f32.mrb[42].mxu1  ;;  %v1422_v56 = vpop.permute.xlu0 %1421 }
 0x553   :  { %v2018_v43 = vpop.eup %2017  ;;  %v1509_v20 = vadd.f32 %v1459_v31, %v1457_v51  ;;  %v1296_v40 = vadd.f32 %v1295_v6, %v1157_v42  ;;  %v1297_v12 = vpop.f32.mrb[43].mxu1 }
 0x554   :  { %v2020_v44 = vpop.eup %2019  ;;  %v1460_v30 = vmul.f32 %v2018_v43, %v1402_v4  ;;  %v1298_v24 = vadd.f32 %v1297_v12, %v1157_v42  ;;  %v1426_v31 = vpop.permute.xlu1 %1425 }
 0x555   :  { %v1461_v33 = vmul.f32 %v2020_v44, %v1402_v4  ;;  %2029 = vtanh.f32 %v1296_v40 }
 0x556   :  { %v1489_v8 = vadd.f32 %v1488_v16, %v1460_v30  ;;  %2031 = vtanh.f32 %v1298_v24  ;;  %v1301_v34 = vpop.f32.mrb[44].mxu1  ;;  %v1185_v30 = vpop.permute.xlu0 %1184 }
 0x557   :  { %v2022_v35 = vpop.eup %2021  ;;  %v1510_v36 = vadd.f32 %v1509_v20, %v1461_v33  ;;  %v1302_v37 = vadd.f32 %v1301_v34, %v2594_v41  ;;  %v1303_v29 = vpop.f32.mrb[45].mxu1 }
 0x558   :  { %v2024_v11 = vpop.eup %2023  ;;  %v1304_v38 = vadd.f32 %v1303_v29, %v2594_v41  ;;  %v1462_v39 = vmul.f32 %v2022_v35, %v2598_v45 }
 0x559   :  { %2033 = vtanh.f32 %v1302_v37  ;;  %v1463_v14 = vmul.f32 %v2024_v11, %v2598_v45  ;;  %v1430_v11 = vpop.permute.xlu1 %1429 }
 0x55a   :  { %2035 = vtanh.f32 %v1304_v38  ;;  %v1307_v32 = vpop.f32.mrb[46].mxu1  ;;  %v1490_v4 = vadd.f32 %v1489_v8, %v1462_v39 }
 0x55b   :  { %v2026_v42 = vpop.eup %2025  ;;  %v1308_v46 = vadd.f32 %v1307_v32, %v2600_v49  ;;  %v1511_v47 = vadd.f32 %v1510_v36, %v1463_v14  ;;  %v1309_v48 = vpop.f32.mrb[47].mxu1 }
 0x55c   :  { %v2028_v9 = vpop.eup %2027  ;;  %v1464_v50 = vmul.f32 %v2026_v42, %v1410_v17  ;;  %v1310_v41 = vadd.f32 %v1309_v48, %v2600_v49 }
 0x55d   :  { %2037 = vtanh.f32 %v1308_v46  ;;  %v1465_v52 = vmul.f32 %v2028_v9, %v1410_v17 }
 0x55e   :  { %v1491_v54 = vadd.f32 %v1490_v4, %v1464_v50  ;;  %2039 = vtanh.f32 %v1310_v41  ;;  %v1313_v55 = vpop.f32.mrb[48].mxu1  ;;  %v1197_v4 = vpop.permute.xlu0 %1196 }
 0x55f   :  { %v2030_v45 = vpop.eup %2029  ;;  %v1512_v57 = vadd.f32 %v1511_v47, %v1465_v52  ;;  %v1314_v58 = vadd.f32 %v1313_v55, %v2596_v2  ;;  %v1315_v10 = vpop.f32.mrb[49].mxu1 }
 0x560   :  { %v2032_v13 = vpop.eup %2031  ;;  %v1466_v62 = vmul.f32 %v2030_v45, %v1414_v15  ;;  %v1316_v63 = vadd.f32 %v1315_v10, %v2596_v2  ;;  %v1434_v52 = vpop.permute.xlu1 %1433 }
 0x561   :  { %v1467_v7 = vmul.f32 %v2032_v13, %v1414_v15  ;;  %2041 = vtanh.f32 %v1314_v58 }
 0x562   :  { %v1492_v21 = vadd.f32 %v1491_v54, %v1466_v62  ;;  %2043 = vtanh.f32 %v1316_v63  ;;  %v1319_v49 = vpop.f32.mrb[50].mxu1  ;;  %v1438_v13 = vpop.permute.xlu0 %1437 }
 0x563   :  { %v2034_v27 = vpop.eup %2033  ;;  %v1513_v1 = vadd.f32 %v1512_v57, %v1467_v7  ;;  %v1320_v3 = vadd.f32 %v1319_v49, %v2604_v59  ;;  %v1321_v23 = vpop.f32.mrb[51].mxu1 }
 0x564   :  { %v2036_v25 = vpop.eup %2035  ;;  %v1468_v5 = vmul.f32 %v2034_v27, %v1418_v60  ;;  %v1322_v26 = vadd.f32 %v1321_v23, %v2604_v59 }
 0x565   :  { %v1469_v28 = vmul.f32 %v2036_v25, %v1418_v60  ;;  %2045 = vtanh.f32 %v1320_v3  ;;  %v1442_v25 = vpop.permute.xlu1 %1441 }
 0x566   :  { %2047 = vtanh.f32 %v1322_v26  ;;  %v1325_v2 = vpop.f32.mrb[52].mxu1  ;;  %v1493_v15 = vadd.f32 %v1492_v21, %v1468_v5 }
 0x567   :  { %v2038_v51 = vpop.eup %2037  ;;  %v1326_v16 = vadd.f32 %v1325_v2, %v2602_v53  ;;  %v1514_v6 = vadd.f32 %v1513_v1, %v1469_v28  ;;  %v1327_v43 = vpop.f32.mrb[53].mxu1 }
 0x568   :  { %v2040_v20 = vpop.eup %2039  ;;  %v1470_v40 = vmul.f32 %v2038_v51, %v1422_v56  ;;  %v1328_v12 = vadd.f32 %v1327_v43, %v2602_v53 }
 0x569   :  { %2049 = vtanh.f32 %v1326_v16  ;;  %v1471_v44 = vmul.f32 %v2040_v20, %v1422_v56 }
 0x56a   :  { %v1494_v59 = vadd.f32 %v1493_v15, %v1470_v40  ;;  %2051 = vtanh.f32 %v1328_v12  ;;  %v1331_v24 = vpop.f32.mrb[54].mxu1  ;;  %v1446_v40 = vpop.permute.xlu1 %1445 }
 0x56b   :  { %v2042_v33 = vpop.eup %2041  ;;  %v1515_v60 = vadd.f32 %v1514_v6, %v1471_v44  ;;  %v1332_v8 = vadd.f32 %v1331_v24, %v2606_v61  ;;  %v1333_v34 = vpop.f32.mrb[55].mxu1 }
 0x56c   :  { %v2044_v35 = vpop.eup %2043  ;;  %v1472_v36 = vmul.f32 %v2042_v33, %v1426_v31  ;;  %v1334_v37 = vadd.f32 %v1333_v34, %v2606_v61  ;;  %v1450_v33 = vpop.permute.xlu0 %1449 }
 0x56d   :  { %v1473_v29 = vmul.f32 %v2044_v35, %v1426_v31  ;;  %2053 = vtanh.f32 %v1332_v8 }
 0x56e   :  { %v1495_v38 = vadd.f32 %v1494_v59, %v1472_v36  ;;  %2055 = vtanh.f32 %v1334_v37  ;;  %v1337_v53 = vpop.f32.mrb[56].mxu1 }
 0x56f   :  { %v2046_v39 = vpop.eup %2045  ;;  %v1516_v17 = vadd.f32 %v1515_v60, %v1473_v29  ;;  %v1338_v14 = vadd.f32 %v1337_v53, %v1185_v30  ;;  %v1339_v32 = vpop.f32.mrb[57].mxu1 }
 0x570   :  { %v2048_v42 = vpop.eup %2047  ;;  %v1474_v46 = vmul.f32 %v2046_v39, %v1430_v11  ;;  %v1340_v47 = vadd.f32 %v1339_v32, %v1185_v30  ;;  %v1454_v29 = vpop.permute.xlu1 %1453 }
 0x571   :  { %v1475_v48 = vmul.f32 %v2048_v42, %v1430_v11  ;;  %2057 = vtanh.f32 %v1338_v14 }
 0x572   :  { %v1496_v9 = vadd.f32 %v1495_v38, %v1474_v46  ;;  %2059 = vtanh.f32 %v1340_v47  ;;  %v1343_v50 = vpop.f32.mrb[58].mxu1 }
 0x573   :  { %v2050_v61 = vpop.eup %2049  ;;  %v1517_v41 = vadd.f32 %v1516_v17, %v1475_v48  ;;  %v1344_v54 = vadd.f32 %v1343_v50, %v2613_v18  ;;  %v1345_v55 = vpop.f32.mrb[59].mxu1  ;;  %v2149_v48 = vmov 1966171168  }
 0x574   :  { %v2052_v45 = vpop.eup %2051  ;;  %v1476_v57 = vmul.f32 %v2050_v61, %v1434_v52  ;;  %v1346_v58 = vadd.f32 %v1345_v55, %v2613_v18  ;;  %v1532_v55 = vpop.permute.xlu0 %1531 }
 0x575   :  { %v1477_v10 = vmul.f32 %v2052_v45, %v1434_v52  ;;  %2061 = vtanh.f32 %v1344_v54 }
 0x576   :  { %v1497_v62 = vadd.f32 %v1496_v9, %v1476_v57  ;;  %2063 = vtanh.f32 %v1346_v58  ;;  %v1349_v63 = vpop.f32.mrb[60].mxu1  ;;  %v1540_v9 = vunpack.c.l.s4 %v2149_v48 }
 0x577   :  { %v2054_v7 = vpop.eup %2053  ;;  %v1518_v21 = vadd.f32 %v1517_v41, %v1477_v10  ;;  %v1350_v49 = vadd.f32 %v1349_v63, %v2618_v0  ;;  %v1351_v27 = vpop.f32.mrb[61].mxu1 }
 0x578   :  { %v2056_v1 = vpop.eup %2055  ;;  %v1478_v3 = vmul.f32 %v2054_v7, %v1438_v13  ;;  %v1352_v23 = vadd.f32 %v1351_v27, %v2618_v0  ;;  %v1541_v54 = vunpack.c.0.s8 %v1540_v9 }
 0x579   :  { %2065 = vtanh.f32 %v1350_v49  ;;  %v1479_v5 = vmul.f32 %v2056_v1, %v1438_v13 }
 0x57a   :  { %v1498_v26 = vadd.f32 %v1497_v62, %v1478_v3  ;;  %2067 = vtanh.f32 %v1352_v23  ;;  %v1355_v18 = vpop.f32.mrb[62].mxu1  ;;  %v1544_v13 = vsub.s32 %v1541_v54, %v2308_v22 }
 0x57b   :  { %v2058_v28 = vpop.eup %2057  ;;  %v1519_v56 = vadd.f32 %v1518_v21, %v1479_v5  ;;  %v1356_v2 = vadd.f32 %v1355_v18, %v1197_v4  ;;  %v1357_v15 = vpop.f32.mrb[63].mxu1 }
 0x57c   :  { %v2060_v51 = vpop.eup %2059  ;;  %v1480_v31 = vmul.f32 %v2058_v28, %v1442_v25  ;;  %v1358_v16 = vadd.f32 %v1357_v15, %v1197_v4 }
 0x57d   :  { %v1481_v6 = vmul.f32 %v2060_v51, %v1442_v25  ;;  %2069 = vtanh.f32 %v1356_v2 }
 0x57e   :  { %v1499_v43 = vadd.f32 %v1498_v26, %v1480_v31  ;;  %2071 = vtanh.f32 %v1358_v16 }
 0x57f   :  { %v2062_v20 = vpop.eup %2061  ;;  %v1520_v0 = vadd.f32 %v1519_v56, %v1481_v6 }
 0x580   :  { %v2064_v12 = vpop.eup %2063  ;;  %v1482_v44 = vmul.f32 %v2062_v20, %v1446_v40 }
 0x581   :  { %v1483_v30 = vmul.f32 %v2064_v12, %v1446_v40 }
 0x582   :  { %v1500_v59 = vadd.f32 %v1499_v43, %v1482_v44 }
 0x583   :  { %v2066_v24 = vpop.eup %2065  ;;  %v1521_v60 = vadd.f32 %v1520_v0, %v1483_v30 }
 0x584   :  { %v2068_v8 = vpop.eup %2067  ;;  %v1484_v34 = vmul.f32 %v2066_v24, %v1450_v33 }
 0x585   :  { %v1485_v35 = vmul.f32 %v2068_v8, %v1450_v33 }
 0x586   :  { %v1501_v36 = vadd.f32 %v1500_v59, %v1484_v34 }
 0x587   :  { %v2070_v37 = vpop.eup %2069  ;;  %v1522_v11 = vadd.f32 %v1521_v60, %v1485_v35 }
 0x588   :  { %v2072_v38 = vpop.eup %2071  ;;  %v1486_v53 = vmul.f32 %v2070_v37, %v1454_v29 }
 0x589   :  { %v1487_v39 = vmul.f32 %v2072_v38, %v1454_v29 }
 0x58a   :  { %v1502_v17 = vadd.f32 %v1501_v36, %v1486_v53 }
 0x58b   :  { %v1523_v14 = vadd.f32 %v1522_v11, %v1487_v39 }
 0x58c   :  { %v1503_v32 = vrot.slane %v1502_v17, 4 }
 0x58d   :  { %v1524_v4 = vrot.slane %v1523_v14, 4 }
 0x58e   :  { %v1504_v42 = vadd.f32 %v1503_v32, %v1502_v17 }
 0x58f   :  { %v1525_v46 = vadd.f32 %v1524_v4, %v1523_v14 }
 0x590   :  { %v1505_v47 = vrot.slane %v1504_v42, 2 }
 0x591   :  { %v1526_v50 = vrot.slane %v1525_v46, 2 }
 0x592   :  { %v1506_v61 = vadd.f32 %v1505_v47, %v1504_v42 }
 0x593   :  { %v1527_v41 = vadd.f32 %v1526_v50, %v1525_v46 }
 0x594   :  { %v1507_v52 = vrot.slane %v1506_v61, 1 }
 0x595   :  { %v1528_v45 = vrot.slane %v1527_v41, 1 }
 0x596   :  { %v1508_v57 = vadd.f32 %v1507_v52, %v1506_v61 }
 0x597   :  { %v1529_v58 = vadd.f32 %v1528_v45, %v1527_v41 }
 0x598   :  { %v1534_v10 = vadd.f32 %v1532_v55, %v1508_v57 }
 0x599   :  { %v1535_v62 = vadd.f32 %v1532_v55, %v1529_v58 }
 0x59b   :  { %v1538_v63 = vcombine.low %v1534_v10, %v1535_v62 }
 0x59d   :  { %v1545_v7 = vrot.slane %v1538_v63, %v1544_v13 }
 0x59f   :  { %v1552_v21 = vrot.slane %v1545_v7, %v1544_v13 }
 0x5a1   :  { %1558 = vst.msk [vmem:[#allocation5] sm:$0x3] %vm1556_vm0, %v1552_v21 }
 0x5a2   :  { %2122 = shalt.err (!%p2119_p12)
}
 0x5a3   :  { %s2123_s10 = scalar_lea.hbm %s2647_s3, 32 }
 0x5a4   :  { %p2124_p13 = scmp.ne.s32.totalorder %s2647_s3, %s2123_s10  ;;  %p2127_p0 = scmp.lt.u32.totalorder %s2123_s10, %s2647_s3 }
 0x5a6   :  { %p2129_p1 = pnand %p2127_p0, %p2124_p13 }
 0x5a8   :  { %2132 = shalt.err (!%p2129_p1)
}
 0x5a9   :  { %1568 = dma.vmem_to_hbm [thread:$0]  %s1566_s6, 32, %s2647_s3, [#allocation4]  }
 0x5aa   :  { %2135 = dma.done.wait [#allocation4], 32  }
 0x5ab   :  { %2136 = vsyncadd [#allocation4], 4294967264 }
 0x5ac   :  { %1572 = vsyncpa [#allocation3], 1 }
 0x5ad   :  { %1573 = vsyncpa [#allocation4], 1 }

</bundles_post_ra>
